<compile_context>
chip_gen: v5e
topology: v5e:2x2
jax: 0.10.0
libtpu: 0.0.40
codegen_flags: <defaults>
</compile_context>

<pallas_src>
import functools

import numpy as np
import jax
import jax.numpy as jnp
from jax.experimental import pallas as pl
from jax.experimental.pallas import tpu as pltpu


def _round_up(x, m):
    return ((x + m - 1) // m) * m


_VMEM_LIMIT = 48 * 1024 * 1024  # fits v7x (64 MiB phys) and raises v5e/v6e default


# --------------------------- Pallas kernels ---------------------------------

def _fused_metapath_kernel(x_ref, wih_ref, whh_ref, b_ref, attn_ref,
                           onehot_ref, expand_ref, w1_ref, b1_ref,
                           out_ref, s_ref, denom_scr, m_scr,
                           *, n_edges, n_nodes, seq_len):
    """Fused metapath pipeline.  grid = (metapath, edge_tile).

    x_ref:      (1, 1, L*Et, D)   bf16  gathered node features, timestep-major
    wih_ref:    (1, 3, D, HD)     bf16  GRU input weights, split [r, z, n]
    whh_ref:    (1, 3, HD, HD)    bf16  GRU hidden weights, split [r, z, n]
    b_ref:      (1, 4, 1, HD)     f32   [b_ir+b_hr, b_iz+b_hz, b_in, b_hn]
    attn_ref:   (1, HD, H)        bf16  block-diagonal attention matrix
    onehot_ref: (1, Ni_pad, Et)   bf16  dst incidence for this edge tile
    expand_ref: (H, HD)           f32   per-head -> per-lane expansion (shared)
    w1_ref:     (HD, A)           bf16  semantic-attention fc1 weight (shared)
    b1_ref:     (1, A)            f32   semantic-attention fc1 bias (shared)
    out_ref:    (1, Ni_pad, HD)   f32   numer accumulator -> ELU(aggregated out)
    s_ref:      (1, 1, A)         f32   sum_n tanh(fc1(out)) (mean done on host)
    denom_scr:  (Ni_pad, H)       f32   running softmax denominator
    m_scr:      (1, H)            f32   running per-head max
    """
    L = seq_len
    LE, D = x_ref.shape[2], x_ref.shape[3]
    E_tile = LE // L
    HD = whh_ref.shape[-1]
    H = attn_ref.shape[-1]

    e_idx = pl.program_id(1)
    n_tiles = pl.num_programs(1)

    @pl.when(e_idx == 0)
    def _init():
        out_ref[...] = jnp.zeros_like(out_ref)
        denom_scr[...] = jnp.zeros_like(denom_scr)
        m_scr[...] = jnp.full(m_scr.shape, -1e30, m_scr.dtype)

    b_r, b_z, b_in, b_hn = b_ref[0, 0], b_ref[0, 1], b_ref[0, 2], b_ref[0, 3]
    wir, wiz, win = wih_ref[0, 0], wih_ref[0, 1], wih_ref[0, 2]
    whr, whz, whn = whh_ref[0, 0], whh_ref[0, 1], whh_ref[0, 2]

    # ---- GRU: batch the input projections across all L timesteps ------------
    # One (L*Et, D)x(D, HD) matmul per gate; the recurrence only does the
    # h @ W_hh matmuls.  (Per-gate split kept because HD < 128 at demo dims;
    # at HD >= 128 re-fuse the hidden weights into a single (HD, 3*HD) matmul.)
    x_flat = x_ref[0, 0]                                           # (L*Et, D) bf16
    pr = jnp.dot(x_flat, wir, preferred_element_type=jnp.float32) + b_r
    pz = jnp.dot(x_flat, wiz, preferred_element_type=jnp.float32) + b_z
    pn = jnp.dot(x_flat, win, preferred_element_type=jnp.float32) + b_in

    h = jnp.zeros((E_tile, HD), jnp.float32)
    for l in range(L):                       # static unroll (L is tiny)
        lo = l * E_tile                      # sublane-aligned static slice
        h_b = h.astype(jnp.bfloat16)
        r = jax.nn.sigmoid(pr[lo:lo + E_tile]
                           + jnp.dot(h_b, whr, preferred_element_type=jnp.float32))
        z = jax.nn.sigmoid(pz[lo:lo + E_tile]
                           + jnp.dot(h_b, whz, preferred_element_type=jnp.float32))
        n = jnp.tanh(pn[lo:lo + E_tile]
                     + r * (jnp.dot(h_b, whn, preferred_element_type=jnp.float32)
                            + b_hn))
        h = (1.0 - z) * n + z * h            # (Et, HD) f32

    # ---- per-head attention logits via block-diagonal matmul ----------------
    a = jnp.dot(h.astype(jnp.bfloat16), attn_ref[0],
                preferred_element_type=jnp.float32)                # (Et, H)
    a = jnp.where(a > 0, a, 0.01 * a)                              # LeakyReLU(0.01)

    e_local = jax.lax.broadcasted_iota(jnp.int32, (E_tile, H), 0)
    valid = (e_local + e_idx * E_tile) < n_edges
    a_masked = jnp.where(valid, a, -1e30)

    # ---- streaming edge softmax (running global per-head max) ---------------
    # TODO(synk): dgl's edge_softmax subtracts a per-destination max; the global
    # max preserves per-destination ratios unless an entire group underflows.
    m_prev = m_scr[...]                                            # (1, H)
    m_new = jnp.maximum(m_prev, jnp.max(a_masked, axis=0, keepdims=True))
    corr = jnp.exp(m_prev - m_new)                                 # (1, H)
    exp_a = jnp.where(valid, jnp.exp(a_masked - m_new), 0.0)       # (Et, H)
    # TODO(synk): attention dropout (p=0.5) treated as eval-mode identity.

    expand = expand_ref[...]                                       # (H, HD) f32
    corr_rep = jnp.dot(corr, expand, preferred_element_type=jnp.float32)   # (1, HD)
    exp_rep = jnp.dot(exp_a, expand, preferred_element_type=jnp.float32)   # (Et, HD)

    onehot = onehot_ref[0]                                         # (Ni_pad, Et) bf16
    weighted = (h * exp_rep).astype(jnp.bfloat16)
    numer = out_ref[0] * corr_rep + jnp.dot(
        onehot, weighted, preferred_element_type=jnp.float32)      # (Ni_pad, HD)
    denom = denom_scr[...] * corr + jnp.dot(
        onehot, exp_a.astype(jnp.bfloat16),
        preferred_element_type=jnp.float32)                        # (Ni_pad, H)

    out_ref[0] = numer
    denom_scr[...] = denom
    m_scr[...] = m_new

    # ---- finalize on the last edge tile --------------------------------------
    @pl.when(e_idx == n_tiles - 1)
    def _finalize():
        denom_rep = jnp.dot(denom, expand, preferred_element_type=jnp.float32)
        pos = denom_rep > 0
        inv = pl.reciprocal(jnp.where(pos, denom_rep, 1.0), approx=True)
        ret = jnp.where(pos, numer * inv, 0.0)       # 0 for no-in-edge nodes
        out_elu = jnp.where(ret > 0, ret, jnp.exp(jnp.minimum(ret, 0.0)) - 1.0)
        out_ref[0] = out_elu
        # semantic-attention partial: sum_n tanh(out @ W1 + b1)
        fc1 = jnp.tanh(jnp.dot(out_elu.astype(jnp.bfloat16), w1_ref[...],
                               preferred_element_type=jnp.float32) + b1_ref[...])
        row = jax.lax.broadcasted_iota(jnp.int32, fc1.shape, 0)
        fc1 = jnp.where(row < n_nodes, fc1, 0.0)     # mask padded dst rows
        s_ref[0] = jnp.sum(fc1, axis=0, keepdims=True)


def _linear_kernel(x_ref, w_ref, b_ref, o_ref):
    o_ref[...] = (jnp.dot(x_ref[...].astype(jnp.bfloat16), w_ref[...],
                          preferred_element_type=jnp.float32) + b_ref[...])


# --------------------------- wrappers ----------------------------------------

def ctr_ntype_forward(features_bf16, ctr_p, idx_list, dst_list, n_nodes,
                      num_heads):
    """MAGNN_ctr_ntype_specific forward for one node type (all metapaths fused)."""
    M = len(idx_list)
    E, L = idx_list[0].shape
    D = features_bf16.shape[1]
    HD = D * num_heads
    A = ctr_p["b1"].shape[1]

    # Edge tiling: one tile at demo size, 512-edge tiles (multiple of 128 for
    # lane-aligned incidence blocks) at real scale.
    E_TILE_MAX = 512
    if E <= E_TILE_MAX:
        E_tile = _round_up(max(E, 8), 8)
        E_pad = E_tile
    else:
        E_tile = E_TILE_MAX
        E_pad = _round_up(E, E_TILE_MAX)
    n_tiles = E_pad // E_tile
    Ni_pad = _round_up(max(n_nodes, 8), 8)

    # ---- host-side index prep (numpy int32, done once) ----------------------
    idx_tiles = np.zeros((M, n_tiles, L * E_tile), np.int32)
    dst_all = np.full((M, E_pad), -1, np.int32)
    for m in range(M):
        idx = np.asarray(idx_list[m], np.int32)                  # (E, L)
        idx_p = np.zeros((E_pad, L), np.int32)
        idx_p[:E] = idx
        # (n_tiles, Et, L) -> (n_tiles, L, Et) -> (n_tiles, L*Et): timestep-major
        idx_tiles[m] = (idx_p.reshape(n_tiles, E_tile, L)
                        .transpose(0, 2, 1).reshape(n_tiles, L * E_tile))
        dst_all[m, :E] = np.asarray(dst_list[m], np.int32)

    # Single fused bf16 gather; no device-side transpose / per-metapath stacking.
    # TODO(synk): at real scale, move this gather into the kernel (features in
    # HBM via memory_space=pl.ANY + scalar-prefetched indices + make_async_copy)
    # so the DMA hides under the GRU/MXU compute.
    x = jnp.take(features_bf16, jnp.asarray(idx_tiles.reshape(-1)), axis=0)
    x = x.reshape(M, n_tiles, L * E_tile, D)                     # bf16

    # Dense destination incidence, tiled along edges by the BlockSpec pipeline.
    # TODO(synk): replace with destination-sorted segment aggregation
    # (scalar-prefetched dst offsets) at real Ni/E — required on v7x (64 MiB
    # VMEM) where O(Ni*E_tile) incidence tiles stop fitting.
    onehot = (jnp.asarray(dst_all)[:, None, :] ==
              jnp.arange(Ni_pad, dtype=jnp.int32)[None, :, None]
              ).astype(jnp.bfloat16)                             # (M, Ni_pad, E_pad)

    # per-head -> per-lane expansion, hoisted out of the kernel (shared input)
    expand = jnp.asarray(np.kron(np.eye(num_heads, dtype=np.float32),
                                 np.ones((1, D), np.float32)))   # (H, HD)

    kernel = functools.partial(_fused_metapath_kernel,
                               n_edges=E, n_nodes=n_nodes, seq_len=L)
    out, s = pl.pallas_call(
        kernel,
        out_shape=(jax.ShapeDtypeStruct((M, Ni_pad, HD), jnp.float32),
                   jax.ShapeDtypeStruct((M, 1, A), jnp.float32)),
        grid_spec=pltpu.PrefetchScalarGridSpec(
            num_scalar_prefetch=0,
            grid=(M, n_tiles),
            in_specs=[
                pl.BlockSpec((1, 1, L * E_tile, D), lambda m, e: (m, e, 0, 0)),
                pl.BlockSpec((1, 3, D, HD), lambda m, e: (m, 0, 0, 0)),
                pl.BlockSpec((1, 3, HD, HD), lambda m, e: (m, 0, 0, 0)),
                pl.BlockSpec((1, 4, 1, HD), lambda m, e: (m, 0, 0, 0)),
                pl.BlockSpec((1, HD, num_heads), lambda m, e: (m, 0, 0)),
                pl.BlockSpec((1, Ni_pad, E_tile), lambda m, e: (m, 0, e)),
                pl.BlockSpec((num_heads, HD), lambda m, e: (0, 0)),
                pl.BlockSpec((HD, A), lambda m, e: (0, 0)),
                pl.BlockSpec((1, A), lambda m, e: (0, 0)),
            ],
            out_specs=(pl.BlockSpec((1, Ni_pad, HD), lambda m, e: (m, 0, 0)),
                       pl.BlockSpec((1, 1, A), lambda m, e: (m, 0, 0))),
            scratch_shapes=[pltpu.VMEM((Ni_pad, num_heads), jnp.float32),
                            pltpu.VMEM((1, num_heads), jnp.float32)]),
        compiler_params=pltpu.CompilerParams(
            dimension_semantics=("parallel", "arbitrary"),
            vmem_limit_bytes=_VMEM_LIMIT),
    )(x, ctr_p["w_ih"], ctr_p["w_hh"], ctr_p["bias"], ctr_p["attn_bd"],
      onehot, expand, ctr_p["w1_t"], ctr_p["b1"])

    # metapath-level semantic attention (tiny M-length reduction -> host glue)
    logits = (s[:, 0, :] / float(n_nodes)) @ ctr_p["w2_t"]       # (M, 1)
    beta = jax.nn.softmax(logits[:, 0])                          # (M,)
    h_t = jnp.einsum("m,mnf->nf", beta, out[:, :n_nodes, :])     # (Ni, HD)
    return h_t


def linear(x, w_t, b):
    Mr, K = x.shape
    N = w_t.shape[1]
    tile_m = min(256, _round_up(max(Mr, 8), 8))   # whole slab at demo size
    M_pad = _round_up(Mr, tile_m)
    xp = jnp.pad(x, ((0, M_pad - Mr), (0, 0))) if M_pad > Mr else x
    out = pl.pallas_call(
        _linear_kernel,
        out_shape=jax.ShapeDtypeStruct((M_pad, N), jnp.float32),
        grid=(M_pad // tile_m,),
        in_specs=[pl.BlockSpec((tile_m, K), lambda i: (i, 0)),
                  pl.BlockSpec((K, N), lambda i: (0, 0)),
                  pl.BlockSpec((1, N), lambda i: (0, 0))],
        out_specs=pl.BlockSpec((tile_m, N), lambda i: (i, 0)),
        compiler_params=pltpu.CompilerParams(
            dimension_semantics=("parallel",),
            vmem_limit_bytes=_VMEM_LIMIT),
    )(xp, w_t, b)
    return out[:Mr]


# --------------------------- forward (MAGNN_nc_layer) ------------------------

def magnn_nc_layer_forward(params, features, type_mask,
                           edge_dst_lists, emp_idx_lists, in_dim, num_heads):
    N = type_mask.shape[0]
    HD = in_dim * num_heads
    features_bf16 = features.astype(jnp.bfloat16)
    h = jnp.zeros((N, HD), jnp.float32)
    for t, ctr_p in enumerate(params["ctr"]):
        node_idx = np.where(type_mask == t)[0]
        h_t = ctr_ntype_forward(features_bf16, ctr_p, emp_idx_lists[t],
                                edge_dst_lists[t], int(node_idx.shape[0]),
                                num_heads)
        h = h.at[jnp.asarray(node_idx)].set(h_t)
    h_fc = linear(h, params["w_fc_t"], params["b_fc"])  # fc_switch=False path
    return h_fc, h


# --------------------------- parameter init ----------------------------------

def xavier_normal(key, shape, gain=1.414):
    fan_out = shape[0]
    fan_in = int(np.prod(shape[1:]))
    std = gain * float(np.sqrt(2.0 / (fan_in + fan_out)))
    return std * jax.random.normal(key, shape, dtype=jnp.float32)


def uniform_init(key, shape, bound):
    return jax.random.uniform(key, shape, jnp.float32, -bound, bound)


# --------------------------- main ---------------------------------------------

if __name__ == "__main__":
    key = jax.random.PRNGKey(0)
    in_dim, num_heads, attn_vec_dim, out_dim = 8, 2, 16, 8
    num_metapaths_list = [2, 2]
    L, E = 3, 16                     # metapath length, edges per metapath graph
    N_per_type = 6
    type_mask = np.array([0] * N_per_type + [1] * N_per_type, dtype=np.int32)
    N = type_mask.shape[0]
    D = in_dim
    HD = in_dim * num_heads

    keys = iter(jax.random.split(key, 64))
    features = jax.random.normal(next(keys), (N, in_dim), dtype=jnp.float32)

    gru_bound = 1.0 / float(np.sqrt(HD))
    ctr_params, edge_dst_lists, emp_idx_lists = [], [], []
    for t, M in enumerate(num_metapaths_list):
        wih_l, whh_l, bias_l, attn_l, dsts, idxs = [], [], [], [], [], []
        for m in range(M):
            w_ih = uniform_init(next(keys), (3 * HD, D), gru_bound)   # torch layout
            w_hh = uniform_init(next(keys), (3 * HD, HD), gru_bound)
            b_ih = uniform_init(next(keys), (3 * HD,), gru_bound)
            b_hh = uniform_init(next(keys), (3 * HD,), gru_bound)
            attn = xavier_normal(next(keys), (num_heads, in_dim))     # (1,H,D) squeezed

            wih_l.append(jnp.stack(
                [jnp.transpose(w_ih[g * HD:(g + 1) * HD]) for g in range(3)]))
            whh_l.append(jnp.stack(
                [jnp.transpose(w_hh[g * HD:(g + 1) * HD]) for g in range(3)]))
            bias_l.append(jnp.stack([
                (b_ih[0:HD] + b_hh[0:HD])[None, :],
                (b_ih[HD:2 * HD] + b_hh[HD:2 * HD])[None, :],
                b_ih[2 * HD:3 * HD][None, :],
                b_hh[2 * HD:3 * HD][None, :]]))                       # (4, 1, HD)

            bd = np.zeros((HD, num_heads), np.float32)                # block-diag attn
            attn_np = np.asarray(attn)
            for hh in range(num_heads):
                bd[hh * D:(hh + 1) * D, hh] = attn_np[hh]
            attn_l.append(jnp.asarray(bd))

            dsts.append(jnp.asarray(np.arange(E) % N_per_type, dtype=jnp.int32))
            idxs.append(jax.random.randint(next(keys), (E, L), 0, N))

        ctr_params.append(dict(
            w_ih=jnp.stack(wih_l).astype(jnp.bfloat16),      # (M, 3, D, HD)
            w_hh=jnp.stack(whh_l).astype(jnp.bfloat16),      # (M, 3, HD, HD)
            bias=jnp.stack(bias_l).astype(jnp.float32),      # (M, 4, 1, HD)
            attn_bd=jnp.stack(attn_l).astype(jnp.bfloat16),  # (M, HD, H)
            w1_t=jnp.transpose(
                xavier_normal(next(keys), (attn_vec_dim, HD))).astype(jnp.bfloat16),
            b1=jnp.zeros((1, attn_vec_dim), jnp.float32),
            w2_t=jnp.transpose(xavier_normal(next(keys), (1, attn_vec_dim))),
        ))
        edge_dst_lists.append(dsts)
        emp_idx_lists.append(idxs)

    params = dict(
        ctr=ctr_params,
        w_fc_t=jnp.transpose(
            xavier_normal(next(keys), (out_dim, HD))).astype(jnp.bfloat16),
        b_fc=jnp.zeros((1, out_dim), jnp.float32),
    )

    h_fc, h = magnn_nc_layer_forward(params, features, type_mask,
                                     edge_dst_lists, emp_idx_lists,
                                     in_dim, num_heads)
    jax.block_until_ready((h_fc, h))
    assert h_fc.shape == (N, out_dim) and h.shape == (N, HD)
    assert bool(jnp.all(jnp.isfinite(h_fc))) and bool(jnp.all(jnp.isfinite(h)))
    print("KERNEL_OK")
</pallas_src>

<mosaic_0001>
module attributes {stable_mosaic.version = 11 : i64} {
  func.func @_fused_metapath_kernel(%arg0: i32, %arg1: i32, %arg2: memref<1x1x48x8xbf16, #tpu.memory_space<vmem>>, %arg3: memref<1x3x8x16xbf16, #tpu.memory_space<vmem>>, %arg4: memref<1x3x16x16xbf16, #tpu.memory_space<vmem>>, %arg5: memref<1x4x1x16xf32, #tpu.memory_space<vmem>>, %arg6: memref<1x16x2xbf16, #tpu.memory_space<vmem>>, %arg7: memref<1x8x16xbf16, #tpu.memory_space<vmem>>, %arg8: memref<2x16xf32, #tpu.memory_space<vmem>>, %arg9: memref<16x16xbf16, #tpu.memory_space<vmem>>, %arg10: memref<1x16xf32, #tpu.memory_space<vmem>>, %arg11: memref<1x8x16xf32, #tpu.memory_space<vmem>>, %arg12: memref<1x1x16xf32, #tpu.memory_space<vmem>>, %arg13: memref<8x2xf32, #tpu.memory_space<vmem>>, %arg14: memref<1x2xf32, #tpu.memory_space<vmem>>) attributes {dimension_semantics = [#tpu.dimension_semantics<parallel>, #tpu.dimension_semantics<arbitrary>], iteration_bounds = array<i64: 2, 1>, scalar_prefetch = 0 : i64, scratch_operands = 2 : i64, tpu.core_type = #tpu.core_type<tc>, window_params = [{transform_indices = @transform_0, window_bounds = array<i64: 1, 1, 48, 8>}, {transform_indices = @transform_1, window_bounds = array<i64: 1, 3, 8, 16>}, {transform_indices = @transform_2, window_bounds = array<i64: 1, 3, 16, 16>}, {transform_indices = @transform_3, window_bounds = array<i64: 1, 4, 1, 16>}, {transform_indices = @transform_4, window_bounds = array<i64: 1, 16, 2>}, {transform_indices = @transform_5, window_bounds = array<i64: 1, 8, 16>}, {pipeline_mode = #tpu.pipeline_mode<synchronous>, transform_indices = @transform_6, window_bounds = array<i64: 2, 16>}, {pipeline_mode = #tpu.pipeline_mode<synchronous>, transform_indices = @transform_7, window_bounds = array<i64: 16, 16>}, {pipeline_mode = #tpu.pipeline_mode<synchronous>, transform_indices = @transform_8, window_bounds = array<i64: 1, 16>}, {transform_indices = @transform_9, window_bounds = array<i64: 1, 8, 16>}, {transform_indices = @transform_10, window_bounds = array<i64: 1, 1, 16>}]} {
    %c0_i32 = arith.constant 0 : i32
    %0 = arith.cmpi eq, %arg1, %c0_i32 : i32
    %1 = arith.extui %0 : i1 to i32
    %c0_i32_0 = arith.constant 0 : i32
    %2 = arith.cmpi ne, %1, %c0_i32_0 : i32
    scf.if %2 {
      %cst_97 = arith.constant 0.000000e+00 : f32
      %177 = vector.broadcast %cst_97 : f32 to vector<1x8x16xf32>
      %c0_98 = arith.constant 0 : index
      %c0_99 = arith.constant 0 : index
      %c0_100 = arith.constant 0 : index
      %178 = vector.load %arg11[%c0_98, %c0_99, %c0_100] : memref<1x8x16xf32, #tpu.memory_space<vmem>>, vector<1x8x16xf32>
      tpu.vector_store %arg11[%c0_98, %c0_99, %c0_100], %177 {strides = array<i32>} : memref<1x8x16xf32, #tpu.memory_space<vmem>>, vector<1x8x16xf32>,
      %cst_101 = arith.constant 0.000000e+00 : f32
      %179 = vector.broadcast %cst_101 : f32 to vector<8x2xf32>
      %c0_102 = arith.constant 0 : index
      %c0_103 = arith.constant 0 : index
      %180 = vector.load %arg13[%c0_102, %c0_103] : memref<8x2xf32, #tpu.memory_space<vmem>>, vector<8x2xf32>
      tpu.vector_store %arg13[%c0_102, %c0_103], %179 {strides = array<i32>} : memref<8x2xf32, #tpu.memory_space<vmem>>, vector<8x2xf32>,
      %cst_104 = arith.constant -1.000000e+30 : f32
      %181 = vector.broadcast %cst_104 : f32 to vector<1x2xf32>
      %c0_105 = arith.constant 0 : index
      %c0_106 = arith.constant 0 : index
      %182 = vector.load %arg14[%c0_105, %c0_106] : memref<1x2xf32, #tpu.memory_space<vmem>>, vector<1x2xf32>
      tpu.vector_store %arg14[%c0_105, %c0_106], %181 {strides = array<i32>} : memref<1x2xf32, #tpu.memory_space<vmem>>, vector<1x2xf32>,
    } else {
    }
    %c0 = arith.constant 0 : index
    %c0_1 = arith.constant 0 : index
    %c0_2 = arith.constant 0 : index
    %c0_3 = arith.constant 0 : index
    %3 = vector.load %arg5[%c0, %c0_1, %c0_2, %c0_3] : memref<1x4x1x16xf32, #tpu.memory_space<vmem>>, vector<1x1x1x16xf32>
    %4 = vector.shape_cast %3 : vector<1x1x1x16xf32> to vector<1x16xf32>
    %c0_4 = arith.constant 0 : index
    %c1 = arith.constant 1 : index
    %c0_5 = arith.constant 0 : index
    %c0_6 = arith.constant 0 : index
    %5 = vector.load %arg5[%c0_4, %c1, %c0_5, %c0_6] : memref<1x4x1x16xf32, #tpu.memory_space<vmem>>, vector<1x1x1x16xf32>
    %6 = vector.shape_cast %5 : vector<1x1x1x16xf32> to vector<1x16xf32>
    %c0_7 = arith.constant 0 : index
    %c2 = arith.constant 2 : index
    %c0_8 = arith.constant 0 : index
    %c0_9 = arith.constant 0 : index
    %7 = vector.load %arg5[%c0_7, %c2, %c0_8, %c0_9] : memref<1x4x1x16xf32, #tpu.memory_space<vmem>>, vector<1x1x1x16xf32>
    %8 = vector.shape_cast %7 : vector<1x1x1x16xf32> to vector<1x16xf32>
    %c0_10 = arith.constant 0 : index
    %c3 = arith.constant 3 : index
    %c0_11 = arith.constant 0 : index
    %c0_12 = arith.constant 0 : index
    %9 = vector.load %arg5[%c0_10, %c3, %c0_11, %c0_12] : memref<1x4x1x16xf32, #tpu.memory_space<vmem>>, vector<1x1x1x16xf32>
    %10 = vector.shape_cast %9 : vector<1x1x1x16xf32> to vector<1x16xf32>
    %c0_13 = arith.constant 0 : index
    %c0_14 = arith.constant 0 : index
    %c0_15 = arith.constant 0 : index
    %c0_16 = arith.constant 0 : index
    %11 = vector.load %arg3[%c0_13, %c0_14, %c0_15, %c0_16] : memref<1x3x8x16xbf16, #tpu.memory_space<vmem>>, vector<1x1x8x16xbf16>
    %12 = vector.shape_cast %11 : vector<1x1x8x16xbf16> to vector<8x16xbf16>
    %c0_17 = arith.constant 0 : index
    %c1_18 = arith.constant 1 : index
    %c0_19 = arith.constant 0 : index
    %c0_20 = arith.constant 0 : index
    %13 = vector.load %arg3[%c0_17, %c1_18, %c0_19, %c0_20] : memref<1x3x8x16xbf16, #tpu.memory_space<vmem>>, vector<1x1x8x16xbf16>
    %14 = vector.shape_cast %13 : vector<1x1x8x16xbf16> to vector<8x16xbf16>
    %c0_21 = arith.constant 0 : index
    %c2_22 = arith.constant 2 : index
    %c0_23 = arith.constant 0 : index
    %c0_24 = arith.constant 0 : index
    %15 = vector.load %arg3[%c0_21, %c2_22, %c0_23, %c0_24] : memref<1x3x8x16xbf16, #tpu.memory_space<vmem>>, vector<1x1x8x16xbf16>
    %16 = vector.shape_cast %15 : vector<1x1x8x16xbf16> to vector<8x16xbf16>
    %c0_25 = arith.constant 0 : index
    %c0_26 = arith.constant 0 : index
    %c0_27 = arith.constant 0 : index
    %c0_28 = arith.constant 0 : index
    %17 = vector.load %arg4[%c0_25, %c0_26, %c0_27, %c0_28] : memref<1x3x16x16xbf16, #tpu.memory_space<vmem>>, vector<1x1x16x16xbf16>
    %18 = vector.shape_cast %17 : vector<1x1x16x16xbf16> to vector<16x16xbf16>
    %c0_29 = arith.constant 0 : index
    %c1_30 = arith.constant 1 : index
    %c0_31 = arith.constant 0 : index
    %c0_32 = arith.constant 0 : index
    %19 = vector.load %arg4[%c0_29, %c1_30, %c0_31, %c0_32] : memref<1x3x16x16xbf16, #tpu.memory_space<vmem>>, vector<1x1x16x16xbf16>
    %20 = vector.shape_cast %19 : vector<1x1x16x16xbf16> to vector<16x16xbf16>
    %c0_33 = arith.constant 0 : index
    %c2_34 = arith.constant 2 : index
    %c0_35 = arith.constant 0 : index
    %c0_36 = arith.constant 0 : index
    %21 = vector.load %arg4[%c0_33, %c2_34, %c0_35, %c0_36] : memref<1x3x16x16xbf16, #tpu.memory_space<vmem>>, vector<1x1x16x16xbf16>
    %22 = vector.shape_cast %21 : vector<1x1x16x16xbf16> to vector<16x16xbf16>
    %c0_37 = arith.constant 0 : index
    %c0_38 = arith.constant 0 : index
    %c0_39 = arith.constant 0 : index
    %c0_40 = arith.constant 0 : index
    %23 = vector.load %arg2[%c0_37, %c0_38, %c0_39, %c0_40] : memref<1x1x48x8xbf16, #tpu.memory_space<vmem>>, vector<1x1x48x8xbf16>
    %24 = vector.shape_cast %23 : vector<1x1x48x8xbf16> to vector<48x8xbf16>
    %cst = arith.constant dense<0.000000e+00> : vector<48x16xf32>
    %25 = tpu.matmul %24, %12, %cst {dimension_numbers = #tpu.dot_dimension_numbers<[1], [0], [0], [1], [0, 0, 1, 1], [], []>} : vector<48x8xbf16>, vector<8x16xbf16>, vector<48x16xf32> -> vector<48x16xf32>
    %26 = vector.broadcast %4 : vector<1x16xf32> to vector<48x16xf32>
    %27 = arith.addf %25, %26 : vector<48x16xf32>
    %cst_41 = arith.constant dense<0.000000e+00> : vector<48x16xf32>
    %28 = tpu.matmul %24, %14, %cst_41 {dimension_numbers = #tpu.dot_dimension_numbers<[1], [0], [0], [1], [0, 0, 1, 1], [], []>} : vector<48x8xbf16>, vector<8x16xbf16>, vector<48x16xf32> -> vector<48x16xf32>
    %29 = vector.broadcast %6 : vector<1x16xf32> to vector<48x16xf32>
    %30 = arith.addf %28, %29 : vector<48x16xf32>
    %cst_42 = arith.constant dense<0.000000e+00> : vector<48x16xf32>
    %31 = tpu.matmul %24, %16, %cst_42 {dimension_numbers = #tpu.dot_dimension_numbers<[1], [0], [0], [1], [0, 0, 1, 1], [], []>} : vector<48x8xbf16>, vector<8x16xbf16>, vector<48x16xf32> -> vector<48x16xf32>
    %32 = vector.broadcast %8 : vector<1x16xf32> to vector<48x16xf32>
    %33 = arith.addf %31, %32 : vector<48x16xf32>
    %cst_43 = arith.constant 0.000000e+00 : f32
    %34 = vector.broadcast %cst_43 : f32 to vector<16x16xf32>
    %35 = arith.truncf %34 : vector<16x16xf32> to vector<16x16xbf16>
    %36 = vector.extract_strided_slice %27 {offsets = [0, 0], sizes = [16, 16], strides = [1, 1]} : vector<48x16xf32> to vector<16x16xf32>
    %cst_44 = arith.constant dense<0.000000e+00> : vector<16x16xf32>
    %37 = tpu.matmul %35, %18, %cst_44 {dimension_numbers = #tpu.dot_dimension_numbers<[1], [0], [0], [1], [0, 0, 1, 1], [], []>} : vector<16x16xbf16>, vector<16x16xbf16>, vector<16x16xf32> -> vector<16x16xf32>
    %38 = arith.addf %36, %37 : vector<16x16xf32>
    %39 = arith.negf %38 : vector<16x16xf32>
    %40 = math.exp %39 : vector<16x16xf32>
    %cst_45 = arith.constant 1.000000e+00 : f32
    %41 = vector.broadcast %cst_45 : f32 to vector<16x16xf32>
    %42 = arith.addf %41, %40 : vector<16x16xf32>
    %43 = arith.divf %41, %42 : vector<16x16xf32>
    %44 = vector.extract_strided_slice %30 {offsets = [0, 0], sizes = [16, 16], strides = [1, 1]} : vector<48x16xf32> to vector<16x16xf32>
    %cst_46 = arith.constant dense<0.000000e+00> : vector<16x16xf32>
    %45 = tpu.matmul %35, %20, %cst_46 {dimension_numbers = #tpu.dot_dimension_numbers<[1], [0], [0], [1], [0, 0, 1, 1], [], []>} : vector<16x16xbf16>, vector<16x16xbf16>, vector<16x16xf32> -> vector<16x16xf32>
    %46 = arith.addf %44, %45 : vector<16x16xf32>
    %47 = arith.negf %46 : vector<16x16xf32>
    %48 = math.exp %47 : vector<16x16xf32>
    %cst_47 = arith.constant 1.000000e+00 : f32
    %49 = vector.broadcast %cst_47 : f32 to vector<16x16xf32>
    %50 = arith.addf %49, %48 : vector<16x16xf32>
    %51 = arith.divf %49, %50 : vector<16x16xf32>
    %52 = vector.extract_strided_slice %33 {offsets = [0, 0], sizes = [16, 16], strides = [1, 1]} : vector<48x16xf32> to vector<16x16xf32>
    %cst_48 = arith.constant dense<0.000000e+00> : vector<16x16xf32>
    %53 = tpu.matmul %35, %22, %cst_48 {dimension_numbers = #tpu.dot_dimension_numbers<[1], [0], [0], [1], [0, 0, 1, 1], [], []>} : vector<16x16xbf16>, vector<16x16xbf16>, vector<16x16xf32> -> vector<16x16xf32>
    %54 = vector.broadcast %10 : vector<1x16xf32> to vector<16x16xf32>
    %55 = arith.addf %53, %54 : vector<16x16xf32>
    %56 = arith.mulf %43, %55 : vector<16x16xf32>
    %57 = arith.addf %52, %56 : vector<16x16xf32>
    %58 = math.tanh %57 : vector<16x16xf32>
    %cst_49 = arith.constant 1.000000e+00 : f32
    %59 = vector.broadcast %cst_49 : f32 to vector<16x16xf32>
    %60 = arith.subf %59, %51 : vector<16x16xf32>
    %61 = arith.mulf %60, %58 : vector<16x16xf32>
    %62 = arith.mulf %51, %34 : vector<16x16xf32>
    %63 = arith.addf %61, %62 : vector<16x16xf32>
    %64 = arith.truncf %63 : vector<16x16xf32> to vector<16x16xbf16>
    %65 = vector.extract_strided_slice %27 {offsets = [16, 0], sizes = [16, 16], strides = [1, 1]} : vector<48x16xf32> to vector<16x16xf32>
    %cst_50 = arith.constant dense<0.000000e+00> : vector<16x16xf32>
    %66 = tpu.matmul %64, %18, %cst_50 {dimension_numbers = #tpu.dot_dimension_numbers<[1], [0], [0], [1], [0, 0, 1, 1], [], []>} : vector<16x16xbf16>, vector<16x16xbf16>, vector<16x16xf32> -> vector<16x16xf32>
    %67 = arith.addf %65, %66 : vector<16x16xf32>
    %68 = arith.negf %67 : vector<16x16xf32>
    %69 = math.exp %68 : vector<16x16xf32>
    %cst_51 = arith.constant 1.000000e+00 : f32
    %70 = vector.broadcast %cst_51 : f32 to vector<16x16xf32>
    %71 = arith.addf %70, %69 : vector<16x16xf32>
    %72 = arith.divf %70, %71 : vector<16x16xf32>
    %73 = vector.extract_strided_slice %30 {offsets = [16, 0], sizes = [16, 16], strides = [1, 1]} : vector<48x16xf32> to vector<16x16xf32>
    %cst_52 = arith.constant dense<0.000000e+00> : vector<16x16xf32>
    %74 = tpu.matmul %64, %20, %cst_52 {dimension_numbers = #tpu.dot_dimension_numbers<[1], [0], [0], [1], [0, 0, 1, 1], [], []>} : vector<16x16xbf16>, vector<16x16xbf16>, vector<16x16xf32> -> vector<16x16xf32>
    %75 = arith.addf %73, %74 : vector<16x16xf32>
    %76 = arith.negf %75 : vector<16x16xf32>
    %77 = math.exp %76 : vector<16x16xf32>
    %cst_53 = arith.constant 1.000000e+00 : f32
    %78 = vector.broadcast %cst_53 : f32 to vector<16x16xf32>
    %79 = arith.addf %78, %77 : vector<16x16xf32>
    %80 = arith.divf %78, %79 : vector<16x16xf32>
    %81 = vector.extract_strided_slice %33 {offsets = [16, 0], sizes = [16, 16], strides = [1, 1]} : vector<48x16xf32> to vector<16x16xf32>
    %cst_54 = arith.constant dense<0.000000e+00> : vector<16x16xf32>
    %82 = tpu.matmul %64, %22, %cst_54 {dimension_numbers = #tpu.dot_dimension_numbers<[1], [0], [0], [1], [0, 0, 1, 1], [], []>} : vector<16x16xbf16>, vector<16x16xbf16>, vector<16x16xf32> -> vector<16x16xf32>
    %83 = vector.broadcast %10 : vector<1x16xf32> to vector<16x16xf32>
    %84 = arith.addf %82, %83 : vector<16x16xf32>
    %85 = arith.mulf %72, %84 : vector<16x16xf32>
    %86 = arith.addf %81, %85 : vector<16x16xf32>
    %87 = math.tanh %86 : vector<16x16xf32>
    %cst_55 = arith.constant 1.000000e+00 : f32
    %88 = vector.broadcast %cst_55 : f32 to vector<16x16xf32>
    %89 = arith.subf %88, %80 : vector<16x16xf32>
    %90 = arith.mulf %89, %87 : vector<16x16xf32>
    %91 = arith.mulf %80, %63 : vector<16x16xf32>
    %92 = arith.addf %90, %91 : vector<16x16xf32>
    %93 = arith.truncf %92 : vector<16x16xf32> to vector<16x16xbf16>
    %94 = vector.extract_strided_slice %27 {offsets = [32, 0], sizes = [16, 16], strides = [1, 1]} : vector<48x16xf32> to vector<16x16xf32>
    %cst_56 = arith.constant dense<0.000000e+00> : vector<16x16xf32>
    %95 = tpu.matmul %93, %18, %cst_56 {dimension_numbers = #tpu.dot_dimension_numbers<[1], [0], [0], [1], [0, 0, 1, 1], [], []>} : vector<16x16xbf16>, vector<16x16xbf16>, vector<16x16xf32> -> vector<16x16xf32>
    %96 = arith.addf %94, %95 : vector<16x16xf32>
    %97 = arith.negf %96 : vector<16x16xf32>
    %98 = math.exp %97 : vector<16x16xf32>
    %cst_57 = arith.constant 1.000000e+00 : f32
    %99 = vector.broadcast %cst_57 : f32 to vector<16x16xf32>
    %100 = arith.addf %99, %98 : vector<16x16xf32>
    %101 = arith.divf %99, %100 : vector<16x16xf32>
    %102 = vector.extract_strided_slice %30 {offsets = [32, 0], sizes = [16, 16], strides = [1, 1]} : vector<48x16xf32> to vector<16x16xf32>
    %cst_58 = arith.constant dense<0.000000e+00> : vector<16x16xf32>
    %103 = tpu.matmul %93, %20, %cst_58 {dimension_numbers = #tpu.dot_dimension_numbers<[1], [0], [0], [1], [0, 0, 1, 1], [], []>} : vector<16x16xbf16>, vector<16x16xbf16>, vector<16x16xf32> -> vector<16x16xf32>
    %104 = arith.addf %102, %103 : vector<16x16xf32>
    %105 = arith.negf %104 : vector<16x16xf32>
    %106 = math.exp %105 : vector<16x16xf32>
    %cst_59 = arith.constant 1.000000e+00 : f32
    %107 = vector.broadcast %cst_59 : f32 to vector<16x16xf32>
    %108 = arith.addf %107, %106 : vector<16x16xf32>
    %109 = arith.divf %107, %108 : vector<16x16xf32>
    %110 = vector.extract_strided_slice %33 {offsets = [32, 0], sizes = [16, 16], strides = [1, 1]} : vector<48x16xf32> to vector<16x16xf32>
    %cst_60 = arith.constant dense<0.000000e+00> : vector<16x16xf32>
    %111 = tpu.matmul %93, %22, %cst_60 {dimension_numbers = #tpu.dot_dimension_numbers<[1], [0], [0], [1], [0, 0, 1, 1], [], []>} : vector<16x16xbf16>, vector<16x16xbf16>, vector<16x16xf32> -> vector<16x16xf32>
    %112 = vector.broadcast %10 : vector<1x16xf32> to vector<16x16xf32>
    %113 = arith.addf %111, %112 : vector<16x16xf32>
    %114 = arith.mulf %101, %113 : vector<16x16xf32>
    %115 = arith.addf %110, %114 : vector<16x16xf32>
    %116 = math.tanh %115 : vector<16x16xf32>
    %cst_61 = arith.constant 1.000000e+00 : f32
    %117 = vector.broadcast %cst_61 : f32 to vector<16x16xf32>
    %118 = arith.subf %117, %109 : vector<16x16xf32>
    %119 = arith.mulf %118, %116 : vector<16x16xf32>
    %120 = arith.mulf %109, %92 : vector<16x16xf32>
    %121 = arith.addf %119, %120 : vector<16x16xf32>
    %122 = arith.truncf %121 : vector<16x16xf32> to vector<16x16xbf16>
    %c0_62 = arith.constant 0 : index
    %c0_63 = arith.constant 0 : index
    %c0_64 = arith.constant 0 : index
    %123 = vector.load %arg6[%c0_62, %c0_63, %c0_64] : memref<1x16x2xbf16, #tpu.memory_space<vmem>>, vector<1x16x2xbf16>
    %124 = vector.shape_cast %123 : vector<1x16x2xbf16> to vector<16x2xbf16>
    %cst_65 = arith.constant dense<0.000000e+00> : vector<16x2xf32>
    %125 = tpu.matmul %122, %124, %cst_65 {dimension_numbers = #tpu.dot_dimension_numbers<[1], [0], [0], [1], [0, 0, 1, 1], [], []>} : vector<16x16xbf16>, vector<16x2xbf16>, vector<16x2xf32> -> vector<16x2xf32>
    %cst_66 = arith.constant 0.000000e+00 : f32
    %126 = vector.broadcast %cst_66 : f32 to vector<16x2xf32>
    %127 = arith.cmpf ogt, %125, %126 : vector<16x2xf32>
    %cst_67 = arith.constant 0.00999999977 : f32
    %128 = vector.broadcast %cst_67 : f32 to vector<16x2xf32>
    %129 = arith.mulf %128, %125 : vector<16x2xf32>
    %130 = arith.select %127, %125, %129 : vector<16x2xi1>, vector<16x2xf32>
    %131 = tpu.iota {dimensions = array<i32: 0>} : vector<16x2xi32>
    %c16_i32 = arith.constant 16 : i32
    %132 = arith.muli %arg1, %c16_i32 : i32
    %133 = vector.broadcast %132 : i32 to vector<16x2xi32>
    %134 = arith.addi %131, %133 : vector<16x2xi32>
    %c16_i32_68 = arith.constant 16 : i32
    %135 = vector.broadcast %c16_i32_68 : i32 to vector<16x2xi32>
    %136 = arith.cmpi slt, %134, %135 : vector<16x2xi32>
    %cst_69 = arith.constant -1.000000e+30 : f32
    %137 = vector.broadcast %cst_69 : f32 to vector<16x2xf32>
    %138 = arith.select %136, %130, %137 : vector<16x2xi1>, vector<16x2xf32>
    %c0_70 = arith.constant 0 : index
    %c0_71 = arith.constant 0 : index
    %139 = vector.load %arg14[%c0_70, %c0_71] : memref<1x2xf32, #tpu.memory_space<vmem>>, vector<1x2xf32>
    %cst_72 = arith.constant dense<0xFF800000> : vector<2xf32>
    %140 = vector.multi_reduction <maximumf>, %138, %cst_72 [0] : vector<16x2xf32> to vector<2xf32>
    %141 = vector.shape_cast %140 : vector<2xf32> to vector<1x2xf32>
    %142 = arith.maximumf %139, %141 : vector<1x2xf32>
    %143 = arith.subf %139, %142 : vector<1x2xf32>
    %144 = math.exp %143 : vector<1x2xf32>
    %145 = vector.broadcast %142 : vector<1x2xf32> to vector<16x2xf32>
    %146 = arith.subf %138, %145 : vector<16x2xf32>
    %147 = math.exp %146 : vector<16x2xf32>
    %cst_73 = arith.constant 0.000000e+00 : f32
    %148 = vector.broadcast %cst_73 : f32 to vector<16x2xf32>
    %149 = arith.select %136, %147, %148 : vector<16x2xi1>, vector<16x2xf32>
    %c0_74 = arith.constant 0 : index
    %c0_75 = arith.constant 0 : index
    %150 = vector.load %arg8[%c0_74, %c0_75] : memref<2x16xf32, #tpu.memory_space<vmem>>, vector<2x16xf32>
    %cst_76 = arith.constant dense<0.000000e+00> : vector<1x16xf32>
    %151 = tpu.matmul %144, %150, %cst_76 {dimension_numbers = #tpu.dot_dimension_numbers<[1], [0], [0], [1], [0, 0, 1, 1], [], []>} : vector<1x2xf32>, vector<2x16xf32>, vector<1x16xf32> -> vector<1x16xf32>
    %cst_77 = arith.constant dense<0.000000e+00> : vector<16x16xf32>
    %152 = tpu.matmul %149, %150, %cst_77 {dimension_numbers = #tpu.dot_dimension_numbers<[1], [0], [0], [1], [0, 0, 1, 1], [], []>} : vector<16x2xf32>, vector<2x16xf32>, vector<16x16xf32> -> vector<16x16xf32>
    %c0_78 = arith.constant 0 : index
    %c0_79 = arith.constant 0 : index
    %c0_80 = arith.constant 0 : index
    %153 = vector.load %arg7[%c0_78, %c0_79, %c0_80] : memref<1x8x16xbf16, #tpu.memory_space<vmem>>, vector<1x8x16xbf16>
    %154 = vector.shape_cast %153 : vector<1x8x16xbf16> to vector<8x16xbf16>
    %155 = arith.mulf %121, %152 : vector<16x16xf32>
    %156 = arith.truncf %155 : vector<16x16xf32> to vector<16x16xbf16>
    %c0_81 = arith.constant 0 : index
    %c0_82 = arith.constant 0 : index
    %c0_83 = arith.constant 0 : index
    %157 = vector.load %arg11[%c0_81, %c0_82, %c0_83] : memref<1x8x16xf32, #tpu.memory_space<vmem>>, vector<1x8x16xf32>
    %158 = vector.shape_cast %157 : vector<1x8x16xf32> to vector<8x16xf32>
    %159 = vector.broadcast %151 : vector<1x16xf32> to vector<8x16xf32>
    %160 = arith.mulf %158, %159 : vector<8x16xf32>
    %cst_84 = arith.constant dense<0.000000e+00> : vector<8x16xf32>
    %161 = tpu.matmul %154, %156, %cst_84 {dimension_numbers = #tpu.dot_dimension_numbers<[1], [0], [0], [1], [0, 0, 1, 1], [], []>} : vector<8x16xbf16>, vector<16x16xbf16>, vector<8x16xf32> -> vector<8x16xf32>
    %162 = arith.addf %160, %161 : vector<8x16xf32>
    %c0_85 = arith.constant 0 : index
    %c0_86 = arith.constant 0 : index
    %163 = vector.load %arg13[%c0_85, %c0_86] : memref<8x2xf32, #tpu.memory_space<vmem>>, vector<8x2xf32>
    %164 = vector.broadcast %144 : vector<1x2xf32> to vector<8x2xf32>
    %165 = arith.mulf %163, %164 : vector<8x2xf32>
    %166 = arith.truncf %149 : vector<16x2xf32> to vector<16x2xbf16>
    %cst_87 = arith.constant dense<0.000000e+00> : vector<8x2xf32>
    %167 = tpu.matmul %154, %166, %cst_87 {dimension_numbers = #tpu.dot_dimension_numbers<[1], [0], [0], [1], [0, 0, 1, 1], [], []>} : vector<8x16xbf16>, vector<16x2xbf16>, vector<8x2xf32> -> vector<8x2xf32>
    %168 = arith.addf %165, %167 : vector<8x2xf32>
    %c0_88 = arith.constant 0 : index
    %c0_89 = arith.constant 0 : index
    %c0_90 = arith.constant 0 : index
    %169 = vector.load %arg11[%c0_88, %c0_89, %c0_90] : memref<1x8x16xf32, #tpu.memory_space<vmem>>, vector<1x8x16xf32>
    %170 = vector.shape_cast %169 : vector<1x8x16xf32> to vector<8x16xf32>
    %171 = vector.shape_cast %162 : vector<8x16xf32> to vector<1x8x16xf32>
    tpu.vector_store %arg11[%c0_88, %c0_89, %c0_90], %171 {strides = array<i32>} : memref<1x8x16xf32, #tpu.memory_space<vmem>>, vector<1x8x16xf32>,
    %c0_91 = arith.constant 0 : index
    %c0_92 = arith.constant 0 : index
    %172 = vector.load %arg13[%c0_91, %c0_92] : memref<8x2xf32, #tpu.memory_space<vmem>>, vector<8x2xf32>
    tpu.vector_store %arg13[%c0_91, %c0_92], %168 {strides = array<i32>} : memref<8x2xf32, #tpu.memory_space<vmem>>, vector<8x2xf32>,
    %c0_93 = arith.constant 0 : index
    %c0_94 = arith.constant 0 : index
    %173 = vector.load %arg14[%c0_93, %c0_94] : memref<1x2xf32, #tpu.memory_space<vmem>>, vector<1x2xf32>
    tpu.vector_store %arg14[%c0_93, %c0_94], %142 {strides = array<i32>} : memref<1x2xf32, #tpu.memory_space<vmem>>, vector<1x2xf32>,
    %c0_i32_95 = arith.constant 0 : i32
    %174 = arith.cmpi eq, %arg1, %c0_i32_95 : i32
    %175 = arith.extui %174 : i1 to i32
    %c0_i32_96 = arith.constant 0 : i32
    %176 = arith.cmpi ne, %175, %c0_i32_96 : i32
    scf.if %176 {
      %cst_97 = arith.constant dense<0.000000e+00> : vector<8x16xf32>
      %177 = tpu.matmul %168, %150, %cst_97 {dimension_numbers = #tpu.dot_dimension_numbers<[1], [0], [0], [1], [0, 0, 1, 1], [], []>} : vector<8x2xf32>, vector<2x16xf32>, vector<8x16xf32> -> vector<8x16xf32>
      %cst_98 = arith.constant 0.000000e+00 : f32
      %178 = vector.broadcast %cst_98 : f32 to vector<8x16xf32>
      %179 = arith.cmpf ogt, %177, %178 : vector<8x16xf32>
      %cst_99 = arith.constant 1.000000e+00 : f32
      %180 = vector.broadcast %cst_99 : f32 to vector<8x16xf32>
      %181 = arith.select %179, %177, %180 : vector<8x16xi1>, vector<8x16xf32>
      %182 = tpu.reciprocal %181 {approx = true} : vector<8x16xf32> -> vector<8x16xf32>
      %183 = arith.mulf %162, %182 : vector<8x16xf32>
      %cst_100 = arith.constant 0.000000e+00 : f32
      %184 = vector.broadcast %cst_100 : f32 to vector<8x16xf32>
      %185 = arith.select %179, %183, %184 : vector<8x16xi1>, vector<8x16xf32>
      %cst_101 = arith.constant 0.000000e+00 : f32
      %186 = vector.broadcast %cst_101 : f32 to vector<8x16xf32>
      %187 = arith.cmpf ogt, %185, %186 : vector<8x16xf32>
      %cst_102 = arith.constant 0.000000e+00 : f32
      %188 = vector.broadcast %cst_102 : f32 to vector<8x16xf32>
      %189 = arith.minimumf %185, %188 : vector<8x16xf32>
      %190 = math.exp %189 : vector<8x16xf32>
      %cst_103 = arith.constant 1.000000e+00 : f32
      %191 = vector.broadcast %cst_103 : f32 to vector<8x16xf32>
      %192 = arith.subf %190, %191 : vector<8x16xf32>
      %193 = arith.select %187, %185, %192 : vector<8x16xi1>, vector<8x16xf32>
      %c0_104 = arith.constant 0 : index
      %c0_105 = arith.constant 0 : index
      %c0_106 = arith.constant 0 : index
      %194 = vector.load %arg11[%c0_104, %c0_105, %c0_106] : memref<1x8x16xf32, #tpu.memory_space<vmem>>, vector<1x8x16xf32>
      %195 = vector.shape_cast %194 : vector<1x8x16xf32> to vector<8x16xf32>
      %196 = vector.shape_cast %193 : vector<8x16xf32> to vector<1x8x16xf32>
      tpu.vector_store %arg11[%c0_104, %c0_105, %c0_106], %196 {strides = array<i32>} : memref<1x8x16xf32, #tpu.memory_space<vmem>>, vector<1x8x16xf32>,
      %197 = arith.truncf %193 : vector<8x16xf32> to vector<8x16xbf16>
      %c0_107 = arith.constant 0 : index
      %c0_108 = arith.constant 0 : index
      %198 = vector.load %arg9[%c0_107, %c0_108] : memref<16x16xbf16, #tpu.memory_space<vmem>>, vector<16x16xbf16>
      %cst_109 = arith.constant dense<0.000000e+00> : vector<8x16xf32>
      %199 = tpu.matmul %197, %198, %cst_109 {dimension_numbers = #tpu.dot_dimension_numbers<[1], [0], [0], [1], [0, 0, 1, 1], [], []>} : vector<8x16xbf16>, vector<16x16xbf16>, vector<8x16xf32> -> vector<8x16xf32>
      %c0_110 = arith.constant 0 : index
      %c0_111 = arith.constant 0 : index
      %200 = vector.load %arg10[%c0_110, %c0_111] : memref<1x16xf32, #tpu.memory_space<vmem>>, vector<1x16xf32>
      %201 = vector.broadcast %200 : vector<1x16xf32> to vector<8x16xf32>
      %202 = arith.addf %199, %201 : vector<8x16xf32>
      %203 = math.tanh %202 : vector<8x16xf32>
      %204 = tpu.iota {dimensions = array<i32: 0>} : vector<8x16xi32>
      %c6_i32 = arith.constant 6 : i32
      %205 = vector.broadcast %c6_i32 : i32 to vector<8x16xi32>
      %206 = arith.cmpi slt, %204, %205 : vector<8x16xi32>
      %cst_112 = arith.constant 0.000000e+00 : f32
      %207 = vector.broadcast %cst_112 : f32 to vector<8x16xf32>
      %208 = arith.select %206, %203, %207 : vector<8x16xi1>, vector<8x16xf32>
      %cst_113 = arith.constant dense<0.000000e+00> : vector<16xf32>
      %209 = vector.multi_reduction <add>, %208, %cst_113 [0] : vector<8x16xf32> to vector<16xf32>
      %210 = vector.shape_cast %209 : vector<16xf32> to vector<1x16xf32>
      %c0_114 = arith.constant 0 : index
      %c0_115 = arith.constant 0 : index
      %c0_116 = arith.constant 0 : index
      %211 = vector.load %arg12[%c0_114, %c0_115, %c0_116] : memref<1x1x16xf32, #tpu.memory_space<vmem>>, vector<1x1x16xf32>
      %212 = vector.shape_cast %211 : vector<1x1x16xf32> to vector<1x16xf32>
      %213 = vector.shape_cast %210 : vector<1x16xf32> to vector<1x1x16xf32>
      tpu.vector_store %arg12[%c0_114, %c0_115, %c0_116], %213 {strides = array<i32>} : memref<1x1x16xf32, #tpu.memory_space<vmem>>, vector<1x1x16xf32>,
    } else {
    }
    return
  }
  func.func @transform_0(%arg0: i32, %arg1: i32) -> (i32, i32, i32, i32) {
    %c0_i32 = arith.constant 0 : i32
    %c0_i32_0 = arith.constant 0 : i32
    %c0_i32_1 = arith.constant 0 : i32
    return %arg0, %arg1, %c0_i32, %c0_i32_0 : i32, i32, i32, i32
  }
  func.func @transform_1(%arg0: i32, %arg1: i32) -> (i32, i32, i32, i32) {
    %c0_i32 = arith.constant 0 : i32
    %c0_i32_0 = arith.constant 0 : i32
    %c0_i32_1 = arith.constant 0 : i32
    %c0_i32_2 = arith.constant 0 : i32
    return %arg0, %c0_i32, %c0_i32_0, %c0_i32_1 : i32, i32, i32, i32
  }
  func.func @transform_2(%arg0: i32, %arg1: i32) -> (i32, i32, i32, i32) {
    %c0_i32 = arith.constant 0 : i32
    %c0_i32_0 = arith.constant 0 : i32
    %c0_i32_1 = arith.constant 0 : i32
    %c0_i32_2 = arith.constant 0 : i32
    return %arg0, %c0_i32, %c0_i32_0, %c0_i32_1 : i32, i32, i32, i32
  }
  func.func @transform_3(%arg0: i32, %arg1: i32) -> (i32, i32, i32, i32) {
    %c0_i32 = arith.constant 0 : i32
    %c0_i32_0 = arith.constant 0 : i32
    %c0_i32_1 = arith.constant 0 : i32
    %c0_i32_2 = arith.constant 0 : i32
    return %arg0, %c0_i32, %c0_i32_0, %c0_i32_1 : i32, i32, i32, i32
  }
  func.func @transform_4(%arg0: i32, %arg1: i32) -> (i32, i32, i32) {
    %c0_i32 = arith.constant 0 : i32
    %c0_i32_0 = arith.constant 0 : i32
    %c0_i32_1 = arith.constant 0 : i32
    return %arg0, %c0_i32, %c0_i32_0 : i32, i32, i32
  }
  func.func @transform_5(%arg0: i32, %arg1: i32) -> (i32, i32, i32) {
    %c0_i32 = arith.constant 0 : i32
    %c0_i32_0 = arith.constant 0 : i32
    return %arg0, %c0_i32, %arg1 : i32, i32, i32
  }
  func.func @transform_6(%arg0: i32, %arg1: i32) -> (i32, i32) {
    %c0_i32 = arith.constant 0 : i32
    %c0_i32_0 = arith.constant 0 : i32
    %c0_i32_1 = arith.constant 0 : i32
    return %c0_i32, %c0_i32_0 : i32, i32
  }
  func.func @transform_7(%arg0: i32, %arg1: i32) -> (i32, i32) {
    %c0_i32 = arith.constant 0 : i32
    %c0_i32_0 = arith.constant 0 : i32
    %c0_i32_1 = arith.constant 0 : i32
    return %c0_i32, %c0_i32_0 : i32, i32
  }
  func.func @transform_8(%arg0: i32, %arg1: i32) -> (i32, i32) {
    %c0_i32 = arith.constant 0 : i32
    %c0_i32_0 = arith.constant 0 : i32
    %c0_i32_1 = arith.constant 0 : i32
    return %c0_i32, %c0_i32_0 : i32, i32
  }
  func.func @transform_9(%arg0: i32, %arg1: i32) -> (i32, i32, i32) {
    %c0_i32 = arith.constant 0 : i32
    %c0_i32_0 = arith.constant 0 : i32
    %c0_i32_1 = arith.constant 0 : i32
    return %arg0, %c0_i32, %c0_i32_0 : i32, i32, i32
  }
  func.func @transform_10(%arg0: i32, %arg1: i32) -> (i32, i32, i32) {
    %c0_i32 = arith.constant 0 : i32
    %c0_i32_0 = arith.constant 0 : i32
    %c0_i32_1 = arith.constant 0 : i32
    return %arg0, %c0_i32, %c0_i32_0 : i32, i32, i32
  }
}

</mosaic_0001>

<bundles_post_ra>
// kernel: tpu_custom_call.1
= control target key start
LH: loop header
LB: loop body
LE: loop exit
PB: predicated region body
PF: predicated region fallthrough
CT: control target
= control target key end

     0   :  { %s2509_s0 = inlined_call_operand.vmem [shape: bf16[2,1,48,8], index: 0, kind: input, shape index: {}]   ;;  %s2510_s1 = inlined_call_operand.hbm [shape: bf16[2,3,8,16], index: 1, kind: input, shape index: {}]   ;;  %s2511_s2 = inlined_call_operand.vmem [shape: bf16[2,3,16,16], index: 2, kind: input, shape index: {}]   ;;  %s2512_s3 = inlined_call_operand.vmem [shape: f32[2,4,1,16], index: 3, kind: input, shape index: {}]   ;;  %s2513_s4 = inlined_call_operand.vmem [shape: bf16[2,16,2], index: 4, kind: input, shape index: {}]   ;;  %s2514_s5 = inlined_call_operand.vmem [shape: bf16[2,8,16], index: 5, kind: input, shape index: {}]   ;;  %s2515_s6 = inlined_call_operand.vmem [shape: f32[2,16], index: 6, kind: input, shape index: {}]   ;;  %s2516_s7 = inlined_call_operand.hbm [shape: bf16[16,16], index: 7, kind: input, shape index: {}]   ;;  %s2517_s8 = inlined_call_operand.vmem [shape: f32[1,16], index: 8, kind: input, shape index: {}]   ;;  %s2518_s9 = inlined_call_operand.hbm [shape: f32[2,8,16], index: 9, kind: output, shape index: {0}]   ;;  %s2519_s10 = inlined_call_operand.hbm [shape: f32[2,1,16], index: 10, kind: output, shape index: {1}]  }
   0x1   :  { %2527 = sst [smem:[#allocation19_spill]] %s2516_s7 }
   0x2   :  { %2528 = sst [smem:[#allocation20_spill]] %s2517_s8 }
   0x3   :  { %2529 = sst [smem:[#allocation21_spill]] %s2518_s9 }
   0x4   :  { %2530 = sst [smem:[#allocation22_spill]] %s2519_s10 }
   0x5   :  { %16 = vsyncpa [#allocation5], 0 }
   0x6   :  { %18 = vsyncpa [#allocation5 + $0x1], 0 }
   0x7   :  { %19 = vsyncpa [#allocation8], 0 }
   0x8   :  { %20 = vsyncpa [#allocation6], 0 }
   0x9   :  { %22 = vsyncpa [#allocation6 + $0x1], 0 }
   0xa   :  { %23 = vsyncpa [#allocation11], 0 }
   0xb   :  { %25 = vsyncpa [#allocation11 + $0x1], 0  ;;  %s2118_s13 = smov 0   ;;  %s2120_s14 = smov 0  }
   0xc   :  { %s2122_s15 = smov 0   ;;  %s2124_s16 = smov 0  }
   0xd   :  { %s2126_s17 = smov 0   ;;  %s2128_s18 = smov 0  }
   0xe LB: > { %2531 = sst [smem:[#allocation16_spill]] %s2035_s13  ;;  %s1605_s19 = sadd.s32 4294967295, %s2055_s18   ;;  %s2055_s18 = sphi %s2128_s18, %s31_s18   ;;  %s2051_s17 = sphi %s2126_s17, %s2557_s17   ;;  %s2047_s16 = sphi %s2124_s16, %s2556_s16   ;;  %s2043_s15 = sphi %s2122_s15, %s2555_s15   ;;  %s2039_s14 = sphi %s2120_s14, %s2554_s14   ;;  %s2035_s13 = sphi %s2118_s13, %s2553_s13  }
   0xf   : > { %s1606_s20 = sadd.s32 4294967294, %s2055_s18   ;;  %p91_p0 = scmp.ne.s32.totalorder %s2039_s14, %s2035_s13 }
  0x10   : > { %p2152_p1 = scmp.eq.s32.totalorder %s1605_s19, 0  ;;  %p2156_p2 = scmp.eq.s32.totalorder %s1605_s19, 1 }
  0x11   : > { %p290_p3 = scmp.eq.s32.totalorder %s1606_s20, 1  ;;  %p1607_p5 = scmp.ge.s32.totalorder %s2055_s18, 1 }
  0x12   : > { %p2162_p4 = por %p2152_p1, %p91_p0  ;;  %p323_p7 = scmp.lt.s32.totalorder %s2055_s18, 3 }
  0x13   : > { %p2167_p6 = por %p290_p3, %p91_p0  ;;  %s2537_s7 = sld [smem:[#allocation19_spill]] }
  0x14   : > { %p2175_p8 = pnand %p1607_p5, %p323_p7  ;;  %s2057_s29 = smov [#allocation7]  }
  0x15   : > { %s2535_s24 = scalar_select %p2167_p6, 1, 0 }
  0x16   : > { %p1727_p9 = pneg %p2175_p8  ;;  %s339_s30 = sshll.u32 %s2057_s29, 4  ;;  %s340_s30 = int_to_ptr.vmem [resolvable:$true] %s339_s30 }
  0x17   : > { %2536 = sst [smem:[#allocation17_spill]] %s2535_s24  ;;  %p1609_p11 = scmp.ge.s32.totalorder %s2055_s18, 2 }
  0x18   : > { %p1728_p10 = pnand %p1727_p9, %p2152_p1  ;;  %s2520_s11 = smov 64  }
  0x19   : > { %s337_s27 = sshll.u32 %s2537_s7, 4  ;;  %s2521_s12 = smov 4   ;;  %s338_s27 = int_to_ptr.hbm [resolvable:$true] %s337_s27 }
  0x1a   : > { %1730 = dma.hbm_to_vmem [thread:$0]  (!%p1728_p10), %s338_s27, 128, %s340_s30, [#allocation8], %s2520_s11, %s2520_s11, %s2521_s12  }
  0x1b   : > { %s43_s19 = sadd.s32 1, %s2051_s17  ;;  %s78_s20 = sadd.s32 1, %s2043_s15 }
  0x1c   : > { %p45_p12 = scmp.ge.s32.totalorder %s43_s19, 2  ;;  %p85_p13 = scmp.ne.s32.totalorder %s2043_s15, %s2039_s14 }
  0x1d   : > { %p86_p0 = scmp.eq.s32.totalorder %s2055_s18, 0  ;;  %p1743_p7 = scmp.lt.s32.totalorder %s2055_s18, 2 }
  0x1e   : > { %s2559_s19 = smov (%p45_p12, %s43_s19), 0  ;;  %p2196_p5 = por %p2156_p2, %p85_p13 }
  0x1f   : > { %2539 = sst [smem:[#allocation18_spill]] %s2559_s19  ;;  %p87_p3 = por %p86_p0, %p85_p13 }
  0x20   : > { %s75_s26 = ssub.s32 %s2051_s17, %s2559_s19  ;;  %s368_s29 = sand.u32 1, %s2043_s15  }
  0x21   : > { %p76_p9 = scmp.eq.s32.totalorder %s75_s26, 0  ;;  %s1713_s7 = smul.u32 12, %s368_s29 }
  0x22   : > { %s1714_s30 = smul.u32 12, %s2051_s17  ;;  %p1732_p10 = pnand %p1743_p7, %p87_p3 }
  0x23   : > { %s2205_s27 = scalar_select %p76_p9, %s2043_s15, %s78_s20  }
  0x24   : > { %s372_s11 = scalar_lea.vmem [#allocation4], %s1713_s7  ;;  %s377_s10 = scalar_lea.hbm %s2510_s1, %s1714_s30 }
  0x25   : > { %s380_s12 = sshll.u32 %s372_s11, 4  ;;  %s378_s22 = sshll.u32 %s377_s10, 4  ;;  %s381_s12 = int_to_ptr.vmem [resolvable:$true] %s380_s12  ;;  %s379_s22 = int_to_ptr.hbm [resolvable:$true] %s378_s22 }
  0x26   : > { %s369_s8 = scalar_lea.sflag [#allocation5], %s368_s29  ;;  %s2541_s9 = smov 4  }
  0x27   : > { %s2542_s19 = smov 64   ;;  %425 = sbr.rel (%p2175_p8) target bundleno = 1252 (0x4e4), region = 56 }
  0x28   : > { %1734 = dma.hbm_to_vmem [thread:$0]  (!%p1732_p10), %s379_s22, 192, %s381_s12, %s369_s8, %s2542_s19, %s2542_s19, %s2541_s9  }
  0x29   : > { %s2217_s7 = sand.u32 (!%p2175_p8), 1, %s2039_s14  }
  0x2a   : > { %s1715_s11 = smul.u32 (!%p2175_p8), 12, %s2217_s7  ;;  %s428_s13 = scalar_lea.sflag (!%p2175_p8), [#allocation5], %s2217_s7 }
  0x2c   : > { %s431_s24 = scalar_lea.vmem [#allocation4], %s1715_s11 }
  0x2d   : > { %2018 = dma.done.wait (%p2162_p4), %s428_s13, 192  }
  0x2e   : > { %2020 = vsyncadd (%p2162_p4), %s428_s13, 4294967104 }
  0x2f   : > { %2022 = dma.done.wait (%p2152_p1), [#allocation8], 128  }
  0x30   : > { %2024 = vsyncadd (%p2152_p1), [#allocation8], 4294967168  ;;  %p508_p2 = scmp.lt.s32.totalorder %s2047_s16, 1  ;;  %vm603_vm0 = vcmask 1043456   ;;  %v556_v1 = vld [vmem:[%s431_s24] sm:$0xf] }
  0x31   : > { %v605_v3 = vsel %vm603_vm0, %v556_v1, 0  ;;  %v1623_v4 = vld [vmem:[%s431_s24 + $0x4] sm:$0xf]  ;;  %v1624_v6 = vld [vmem:[%s431_s24 + $0x8] sm:$0xf]  ;;  %vm593_vm1 = vcmask 64512  }
  0x32   : > { %s2231_s8 = scalar_select %p508_p2, %s2047_s16, 1  ;;  %614 = vmatpush.bf16.msra.mxu0 %v605_v3  ;;  %v635_v7 = vsel %vm603_vm0, %v1623_v4, 0  ;;  %v665_v8 = vsel %vm603_vm0, %v1624_v6, 0  ;;  %v2060_v10 = vmov 0  }
  0x33   : > { %644 = vmatpush.bf16.msra.mxu1 %v635_v7  ;;  %674 = vmatpush.bf16.msra.mxu2 %v665_v8  ;;  %s1613_s23 = sshll.u32 %s2217_s7, 3  ;;  %s2547_s29 = sld [smem:[#allocation21_spill]] }
  0x34   : > { %s1716_s9 = smul.u32 24, %s2231_s8  ;;  %s1616_s10 = sshll.u32 %s2231_s8, 2 }
  0x35   : > { %s2250_s30 = scalar_lea.vmem %s2512_s3, %s1616_s10  ;;  %s1704_s22 = sshll.u32 %s2231_s8, 3 }
  0x36   : > { %s521_s12 = scalar_lea.vmem %s2511_s2, %s1716_s9  ;;  %s2241_s21 = scalar_lea.vmem %s2509_s0, %s1716_s9  ;;  %v2262_v12 = vld [vmem:[%s2250_s30] ss:$0 sm:$0xff]  ;;  %v2271_v22 = vld [vmem:[%s2250_s30 + $0x1] ss:$0 sm:$0xff]  ;;  %v2276_v50 = vld [vmem:[%s2250_s30 + $0x3] ss:$0 sm:$0xff] }
  0x37   : > { %v1705_v0 = vld [vmem:[%s521_s12] sm:$0xff]  ;;  %v1706_v5 = vld [vmem:[%s521_s12 + $0x8] sm:$0xff]  ;;  %v1707_v9 = vld [vmem:[%s521_s12 + $0x10] sm:$0xff]  ;;  %s530_s24 = scalar_lea.vmem %s2513_s4, %s1704_s22  ;;  %s537_s20 = scalar_lea.vmem %s2514_s5, %s1616_s10 }
  0x38   : > { %v1708_v2 = vld [vmem:[%s2241_s21] sm:$0xff]  ;;  %708 = vmatpush.bf16.msra.mxu3 %v1705_v0  ;;  %863 = vmatpush.bf16.msrb.mxu0 %v1705_v0  ;;  %v1709_v11 = vld [vmem:[%s2241_s21 + $0x8] sm:$0xff]  ;;  %v1710_v20 = vld [vmem:[%s2241_s21 + $0x10] sm:$0xff]  ;;  %s2432_s21 = scalar_lea.vmem [#allocation9], %s1613_s23  ;;  %s1701_s8 = sshll.u32 %s2047_s16, 3 }
  0x39   : > { %1641 = vmatmul.msk.bf16.vlgmr.msra.gmra.mxu0 %vm593_vm1, %v1708_v2  ;;  %1644 = vmatmul.msk.bf16.vlgmr.msra.gmra.mxu1 %vm593_vm1, %v1708_v2  ;;  %v2283_v60 = vld [vmem:[%s2250_s30 + $0x2] ss:$0 sm:$0xff]  ;;  %s1399_s30 = scalar_lea.hbm %s2547_s29, %s1701_s8  ;;  %s1401_s22 = sshll.u32 %s2432_s21, 4  ;;  %s1402_s22 = int_to_ptr.vmem [resolvable:$true] %s1401_s22 }
  0x3a   : > { %1647 = vmatmul.msk.bf16.vlgmr.msra.gmra.mxu2 %vm593_vm1, %v1708_v2  ;;  %917 = vmatpush.bf16.msrb.mxu1 %v1706_v5  ;;  %s1403_s11 = sshll.u32 %s1399_s30, 4  ;;  %s1385_s13 = scalar_lea.sflag [#allocation6], %s2217_s7  ;;  %s1404_s11 = int_to_ptr.hbm [resolvable:$true] %s1403_s11 }
  0x3b   : > { %709 = vmatmul.bf16.vlgmr.msra.gmra.mxu3 %v2060_v10  ;;  %971 = vmatpush.bf16.msrb.mxu2 %v1707_v9  ;;  %s1957_s12 = scalar_lea.hbm %s2547_s29, 16 }
  0x3c   : > { %768 = vmatpush.bf16.msrb.mxu3 %v1706_v5  ;;  %1057 = vmatpush.bf16.msra.mxu0 %v1706_v5 }
  0x3e   : > { %1111 = vmatpush.bf16.msra.mxu1 %v1707_v9 }
  0x40   : > { %831 = vmatpush.bf16.msra.mxu3 %v1707_v9 }
  0x49   : > { %1642 = vmatmul.msk.bf16.gmra.mxu0 %vm593_vm1, %v1709_v11  ;;  %1645 = vmatmul.msk.bf16.gmra.mxu1 %vm593_vm1, %v1709_v11 }
  0x4a   : > { %1648 = vmatmul.msk.bf16.gmra.mxu2 %vm593_vm1, %v1709_v11 }
  0x4b   : > { %769 = vmatmul.bf16.vlgmr.msrb.gmra.mxu3 %v2060_v10 }
  0x4c   : > { %1003 = vmatpush.bf16.msrb.mxu3 %v1705_v0 }
  0x59   : > { %1643 = vmatmul.msk.bf16.gmra.mxu0 %vm593_vm1, %v1710_v20  ;;  %1646 = vmatmul.msk.bf16.gmra.mxu1 %vm593_vm1, %v1710_v20 }
  0x5a   : > { %1649 = vmatmul.msk.bf16.gmra.mxu2 %vm593_vm1, %v1710_v20 }
  0x5b   : > { %832 = vmatmul.bf16.vlgmr.msra.gmra.mxu3 %v2060_v10 }
  0xb6   : > { %v616_v13 = vpop.f32.mrf.mxu0  ;;  %v646_v24 = vpop.f32.mrf.mxu1 }
  0xb7   : > { %v617_v14 = vadd.f32 %v2262_v12, %v616_v13  ;;  %v647_v28 = vadd.f32 %v2271_v22, %v646_v24 }
  0xbd   : > { %v676_v47 = vpop.f32.mrf.mxu2 }
  0xbe   : > { %v710_v15 = vpop.f32.mrf.mxu3  ;;  %v618_v17 = vpop.f32.mrf.mxu0  ;;  %v677_v6 = vadd.f32 %v2283_v60, %v676_v47 }
  0xbf   : > { %v715_v16 = vadd.f32 %v710_v15, %v617_v14  ;;  %v619_v19 = vadd.f32 %v2262_v12, %v618_v17  ;;  %v648_v35 = vpop.f32.mrf.mxu1 }
  0xc0   : > { %v649_v37 = vadd.f32 %v2271_v22, %v648_v35 }
  0xc1   : > { %v1654_v18 = vmul.f32 -1.442695, %v715_v16 }
  0xc3   : > { %1805 = vpow2.f32 %v1654_v18 }
  0xc5   : > { %v678_v11 = vpop.f32.mrf.mxu2 }
  0xc6   : > { %v712_v21 = vpop.f32.mrf.mxu3 }
  0xc7   : > { %v716_v23 = vadd.f32 %v712_v21, %v619_v19  ;;  %v679_v21 = vadd.f32 %v2283_v60, %v678_v11  ;;  %v651_v47 = vpop.f32.mrf.mxu1 }
  0xc9   : > { %v1806_v25 = vpop.eup %1805  ;;  %v1655_v26 = vmul.f32 -1.442695, %v716_v23 }
  0xca   : > { %v723_v27 = vadd.f32 1.0, %v1806_v25 }
  0xcb   : > { %1807 = vpow2.f32 %v1655_v26 }
  0xcc   : > { %1809 = vrcp.f32 %v723_v27  ;;  %v736_v52 = vand.u32 2147483648, %v723_v27  ;;  %vm730_vm3 = vweird.f32 %v723_v27  ;;  %v734_v54 = vand.u32 2147483647, %v723_v27 }
  0xce   : > { %v770_v29 = vpop.f32.mrf.mxu3  ;;  %v737_v1 = vor.u32 1.1754944e-38, %v736_v52  ;;  %vm735_vm7 = vcmp.eq.f32.partialorder %v734_v54, 8.507059e+37  ;;  %v2304_v54 = vpop.f32.mrf.mxu2 }
  0xcf   : > { %v775_v30 = vadd.f32 %v770_v29, %v647_v28 }
  0xd1   : > { %v1808_v31 = vpop.eup %1807  ;;  %v1660_v32 = vmul.f32 -1.442695, %v775_v30 }
  0xd2   : > { %v1810_v33 = vpop.eup %1809  ;;  %v724_v34 = vadd.f32 1.0, %v1808_v31 }
  0xd3   : > { %1811 = vpow2.f32 %v1660_v32  ;;  %v726_v36 = vmul.f32 %v1810_v33, %v723_v27  ;;  %vm731_vm2 = vweird.f32 %v1810_v33 }
  0xd4   : > { %1813 = vrcp.f32 %v724_v34  ;;  %vm2278_vm4 = vmor %vm730_vm3, %vm731_vm2  ;;  %v751_v63 = vand.u32 2147483648, %v724_v34  ;;  %vm745_vm6 = vweird.f32 %v724_v34  ;;  %v749_v2 = vand.u32 2147483647, %v724_v34 }
  0xd5   : > { %v727_v39 = vsub.f32 1.0, %v726_v36  ;;  %vm543_vm2 = vcmask 130048  }
  0xd6   : > { %v772_v38 = vpop.f32.mrf.mxu3  ;;  %v752_v8 = vor.u32 1.1754944e-38, %v751_v63  ;;  %vm750_vm10 = vcmp.eq.f32.partialorder %v749_v2, 8.507059e+37 }
  0xd7   : > { %v776_v40 = vadd.f32 %v772_v38, %v649_v37  ;;  %v728_v45 = vmul.f32 %v1810_v33, %v727_v39 }
  0xd9   : > { %v1812_v41 = vpop.eup %1811  ;;  %v1661_v42 = vmul.f32 -1.442695, %v776_v40  ;;  %v729_v49 = vadd.f32 %v1810_v33, %v728_v45 }
  0xda   : > { %v1814_v43 = vpop.eup %1813  ;;  %v783_v44 = vadd.f32 1.0, %v1812_v41 }
  0xdb   : > { %1815 = vpow2.f32 %v1661_v42  ;;  %v741_v46 = vmul.f32 %v1814_v43, %v724_v34  ;;  %vm746_vm5 = vweird.f32 %v1814_v43  ;;  %v733_v61 = vsel %vm2278_vm4, %v1810_v33, %v729_v49  ;;  %v653_v49 = vpop.f32.mrf.mxu1 }
  0xdc   : > { %1817 = vrcp.f32 %v783_v44  ;;  %vm747_vm8 = vmor %vm745_vm6, %vm746_vm5  ;;  %v738_v4 = vsel %vm735_vm7, %v737_v1, %v733_v61  ;;  %v796_v14 = vand.u32 2147483648, %v783_v44  ;;  %vm790_vm11 = vweird.f32 %v783_v44 }
  0xdd   : > { %v742_v48 = vsub.f32 1.0, %v741_v46  ;;  %v794_v18 = vand.u32 2147483647, %v783_v44 }
  0xde   : > { %v833_v51 = vpop.f32.mrf.mxu3  ;;  %v797_v25 = vor.u32 1.1754944e-38, %v796_v14 }
  0xdf   : > { %v743_v53 = vmul.f32 %v1814_v43, %v742_v48  ;;  %v834_v62 = vadd.f32 %v2276_v50, %v833_v51  ;;  %vm795_vm13 = vcmp.eq.f32.partialorder %v794_v18, 8.507059e+37  ;;  %v621_v48 = vpop.f32.mrf.mxu0 }
  0xe1   : > { %v1816_v55 = vpop.eup %1815  ;;  %v744_v57 = vadd.f32 %v1814_v43, %v743_v53  ;;  %v838_v7 = vmul.f32 %v834_v62, %v738_v4 }
  0xe2   : > { %v1818_v58 = vpop.eup %1817  ;;  %v784_v59 = vadd.f32 1.0, %v1816_v55 }
  0xe3   : > { %v786_v0 = vmul.f32 %v1818_v58, %v783_v44  ;;  %v748_v5 = vsel %vm747_vm8, %v1814_v43, %v744_v57  ;;  %vm791_vm9 = vweird.f32 %v1818_v58  ;;  %v840_v20 = vadd.f32 %v838_v7, %v677_v6  ;;  %v2300_v52 = vpop.f32.mrf.mxu1  ;;  %v2310_v57 = vpop.f32.mrf.mxu2 }
  0xe4   : > { %1819 = vrcp.f32 %v784_v59  ;;  %v753_v15 = vsel %vm750_vm10, %v752_v8, %v748_v5  ;;  %vm792_vm12 = vmor %vm790_vm11, %vm791_vm9  ;;  %v811_v28 = vand.u32 2147483648, %v784_v59  ;;  %v809_v31 = vand.u32 2147483647, %v784_v59 }
  0xe5   : > { %v787_v3 = vsub.f32 1.0, %v786_v0  ;;  %1821 = vtanh.f32 %v840_v20  ;;  %vm805_vm15 = vweird.f32 %v784_v59  ;;  %v654_v5 = vadd.f32 %v2271_v22, %v653_v49 }
  0xe6   : > { %v835_v9 = vpop.f32.mrf.mxu3  ;;  %v812_v34 = vor.u32 1.1754944e-38, %v811_v28  ;;  %vm810_vm1 = vcmp.eq.f32.partialorder %v809_v31, 8.507059e+37 }
  0xe7   : > { %v788_v10 = vmul.f32 %v1818_v58, %v787_v3  ;;  %v836_v13 = vadd.f32 %v2276_v50, %v835_v9  ;;  %v623_v51 = vpop.f32.mrf.mxu0 }
  0xe8   : > { %v624_v4 = vadd.f32 %v2262_v12, %v623_v51 }
  0xe9   : > { %v839_v16 = vmul.f32 %v836_v13, %v753_v15  ;;  %v789_v17 = vadd.f32 %v1818_v58, %v788_v10 }
  0xea   : > { %v1820_v19 = vpop.eup %1819 }
  0xeb   : > { %v801_v23 = vmul.f32 %v1820_v19, %v784_v59  ;;  %v793_v24 = vsel %vm792_vm12, %v1818_v58, %v789_v17  ;;  %v841_v26 = vadd.f32 %v839_v16, %v679_v21  ;;  %vm806_vm14 = vweird.f32 %v1820_v19  ;;  %v1822_v36 = vpop.eup %1821  ;;  %v2306_v55 = vpop.f32.mrf.mxu1 }
  0xec   : > { %v798_v29 = vsel %vm795_vm13, %v797_v25, %v793_v24  ;;  %vm807_vm0 = vmor %vm805_vm15, %vm806_vm14  ;;  %v622_v58 = vadd.f32 %v2262_v12, %v621_v48  ;;  %v652_v59 = vadd.f32 %v2271_v22, %v651_v47  ;;  %v2314_v3 = vpop.f32.mrf.mxu2  ;;  %v682_v48 = vadd.f32 %v2283_v60, %v2304_v54 }
  0xed   : > { %v802_v27 = vsub.f32 1.0, %v801_v23  ;;  %1823 = vtanh.f32 %v841_v26  ;;  %v844_v33 = vsub.f32 1.0, %v798_v29  ;;  %v848_v42 = vmul.f32 0.0, %v798_v29 }
  0xef   : > { %v803_v30 = vmul.f32 %v1820_v19, %v802_v27  ;;  %v846_v39 = vmul.f32 %v1822_v36, %v844_v33  ;;  %v2302_v53 = vpop.f32.mrf.mxu0 }
  0xf1   : > { %v804_v32 = vadd.f32 %v1820_v19, %v803_v30  ;;  %v2291_v44 = vadd.f32 %v848_v42, %v846_v39 }
  0xf3   : > { %v808_v35 = vsel %vm807_vm0, %v1820_v19, %v804_v32  ;;  %v1824_v40 = vpop.eup %1823 }
  0xf4   : > { %v813_v37 = vsel %vm810_vm1, %v812_v34, %v808_v35  ;;  %v2320_v17 = vpop.f32.mrf.mxu2 }
  0xf5   : > { %v845_v38 = vsub.f32 1.0, %v813_v37  ;;  %v849_v43 = vmul.f32 0.0, %v813_v37 }
  0xf7   : > { %v847_v41 = vmul.f32 %v1824_v40, %v845_v38  ;;  %v2308_v56 = vpop.f32.mrf.mxu0 }
  0xf9   : > { %v2293_v45 = vadd.f32 %v849_v43, %v847_v41 }
  0xfb   : > { %v852_v46 = vpack.c.bf16 %v2293_v45, %v2291_v44 }
  0xfd   : > { %1666 = vmatmul.msk.bf16.vlgmr.msrb.gmra.mxu0 %vm543_vm2, %v852_v46  ;;  %1669 = vmatmul.msk.bf16.vlgmr.msrb.gmra.mxu1 %vm543_vm2, %v852_v46 }
  0xfe   : > { %1672 = vmatmul.msk.bf16.vlgmr.msrb.gmra.mxu2 %vm543_vm2, %v852_v46 }
 0x17a   : > { %v865_v61 = vpop.f32.mrf.mxu0  ;;  %v919_v62 = vpop.f32.mrf.mxu1 }
 0x17b   : > { %v870_v63 = vadd.f32 %v865_v61, %v622_v58  ;;  %v924_v0 = vadd.f32 %v919_v62, %v652_v59 }
 0x17d   : > { %v1667_v1 = vmul.f32 -1.442695, %v870_v63  ;;  %v1670_v2 = vmul.f32 -1.442695, %v924_v0 }
 0x17f   : > { %1825 = vpow2.f32 %v1667_v1 }
 0x180   : > { %1827 = vpow2.f32 %v1670_v2 }
 0x181   : > { %v973_v29 = vpop.f32.mrf.mxu2 }
 0x182   : > { %v867_v6 = vpop.f32.mrf.mxu0  ;;  %v921_v7 = vpop.f32.mrf.mxu1  ;;  %v974_v37 = vadd.f32 %v2276_v50, %v973_v29 }
 0x183   : > { %v871_v8 = vadd.f32 %v867_v6, %v624_v4  ;;  %v925_v9 = vadd.f32 %v921_v7, %v654_v5 }
 0x185   : > { %v1826_v10 = vpop.eup %1825  ;;  %v1668_v11 = vmul.f32 -1.442695, %v871_v8  ;;  %v1671_v15 = vmul.f32 -1.442695, %v925_v9  ;;  %v684_v8 = vadd.f32 %v2283_v60, %v2310_v57 }
 0x186   : > { %v1828_v13 = vpop.eup %1827  ;;  %v878_v14 = vadd.f32 1.0, %v1826_v10 }
 0x187   : > { %v2318_v16 = vadd.f32 1.0, %v1828_v13  ;;  %1829 = vpow2.f32 %v1668_v11 }
 0x188   : > { %1831 = vrcp.f32 %v878_v14  ;;  %v891_v28 = vand.u32 2147483648, %v878_v14  ;;  %v889_v31 = vand.u32 2147483647, %v878_v14  ;;  %vm885_vm4 = vweird.f32 %v878_v14 }
 0x189   : > { %1833 = vrcp.f32 %v2318_v16  ;;  %v975_v59 = vpop.f32.mrf.mxu2  ;;  %vm939_vm8 = vweird.f32 %v2318_v16  ;;  %v945_v2 = vand.u32 2147483648, %v2318_v16  ;;  %v943_v5 = vand.u32 2147483647, %v2318_v16 }
 0x18a   : > { %1835 = vpow2.f32 %v1671_v15  ;;  %v892_v35 = vor.u32 1.1754944e-38, %v891_v28  ;;  %vm890_vm6 = vcmp.eq.f32.partialorder %v889_v31, 8.507059e+37  ;;  %v976_v4 = vadd.f32 %v2276_v50, %v975_v59 }
 0x18b   : > { %vm944_vm1 = vcmp.eq.f32.partialorder %v943_v5, 8.507059e+37 }
 0x18d   : > { %v1830_v18 = vpop.eup %1829 }
 0x18e   : > { %v1832_v19 = vpop.eup %1831  ;;  %v879_v20 = vadd.f32 1.0, %v1830_v18 }
 0x18f   : > { %v2323_v21 = vpop.eup %1833  ;;  %v881_v23 = vmul.f32 %v1832_v19, %v878_v14  ;;  %vm886_vm3 = vweird.f32 %v1832_v19  ;;  %v946_v14 = vor.u32 1.1754944e-38, %v945_v2 }
 0x190   : > { %v1836_v24 = vpop.eup %1835  ;;  %1837 = vrcp.f32 %v879_v20  ;;  %v935_v27 = vmul.f32 %v2323_v21, %v2318_v16  ;;  %vm887_vm5 = vmor %vm885_vm4, %vm886_vm3  ;;  %v906_v47 = vand.u32 2147483648, %v879_v20  ;;  %v904_v51 = vand.u32 2147483647, %v879_v20 }
 0x191   : > { %v882_v25 = vsub.f32 1.0, %v881_v23  ;;  %v2325_v26 = vadd.f32 1.0, %v1836_v24  ;;  %vm900_vm9 = vweird.f32 %v879_v20  ;;  %vm940_vm10 = vweird.f32 %v2323_v21 }
 0x192   : > { %v936_v34 = vsub.f32 1.0, %v935_v27  ;;  %v907_v1 = vor.u32 1.1754944e-38, %v906_v47  ;;  %vm905_vm12 = vcmp.eq.f32.partialorder %v904_v51, 8.507059e+37  ;;  %vm941_vm14 = vmor %vm939_vm8, %vm940_vm10  ;;  %v1711_v47 = vld [vmem:[%s530_s24] sm:$0xff]  ;;  %s1951_s24 = sshra.s32 %s1404_s11, 4  ;;  %s1952_s24 = int_to_ptr.hbm [resolvable:$true] %s1951_s24 }
 0x193   : > { %v883_v30 = vmul.f32 %v1832_v19, %v882_v25  ;;  %1839 = vrcp.f32 %v2325_v26  ;;  %v960_v9 = vand.u32 2147483648, %v2325_v26  ;;  %vm954_vm15 = vweird.f32 %v2325_v26  ;;  %1151 = vmatpush.bf16.msra.mxu2 %v1711_v47  ;;  %s1953_s9 = scalar_lea.hbm %s1952_s24, 8  ;;  %p1958_p12 = scmp.lt.s32.totalorder %s1952_s24, %s2547_s29 }
 0x194   : > { %v937_v43 = vmul.f32 %v2323_v21, %v936_v34  ;;  %v958_v13 = vand.u32 2147483647, %v2325_v26  ;;  %v627_v34 = vadd.f32 %v2262_v12, %v2302_v53  ;;  %p1954_p1 = scmp.ne.s32.totalorder %s1952_s24, %s1953_s9  ;;  %p1959_p13 = scmp.lt.s32.totalorder %s1957_s12, %s1953_s9 }
 0x195   : > { %v884_v32 = vadd.f32 %v1832_v19, %v883_v30  ;;  %v961_v57 = vor.u32 1.1754944e-38, %v960_v9 }
 0x196   : > { %v1838_v33 = vpop.eup %1837  ;;  %v938_v63 = vadd.f32 %v2323_v21, %v937_v43  ;;  %vm959_vm3 = vcmp.eq.f32.partialorder %v958_v13, 8.507059e+37  ;;  %v629_v43 = vadd.f32 %v2262_v12, %v2308_v56  ;;  %p1955_p4 = pnand %p1954_p1, %p2196_p5  ;;  %p1960_p0 = por %p1959_p13, %p1958_p12 }
 0x197   : > { %v888_v36 = vsel %vm887_vm5, %v1832_v19, %v884_v32  ;;  %v896_v38 = vmul.f32 %v1838_v33, %v879_v20  ;;  %vm901_vm7 = vweird.f32 %v1838_v33  ;;  %v657_v32 = vadd.f32 %v2271_v22, %v2300_v52 }
 0x198   : > { %v893_v39 = vsel %vm890_vm6, %v892_v35, %v888_v36  ;;  %vm902_vm11 = vmor %vm900_vm9, %vm901_vm7  ;;  %v942_v11 = vsel %vm941_vm14, %v2323_v21, %v938_v63  ;;  %v659_v36 = vadd.f32 %v2271_v22, %v2306_v55  ;;  %p1956_p8 = pneg %p1955_p4 }
 0x199   : > { %v1840_v40 = vpop.eup %1839  ;;  %v978_v41 = vmul.f32 %v974_v37, %v893_v39  ;;  %v897_v42 = vsub.f32 1.0, %v896_v38  ;;  %v947_v19 = vsel %vm944_vm1, %v946_v14, %v942_v11 }
 0x19a   : > { %v950_v46 = vmul.f32 %v1840_v40, %v2325_v26  ;;  %vm955_vm13 = vweird.f32 %v1840_v40  ;;  %v984_v23 = vsub.f32 1.0, %v947_v19  ;;  %v988_v28 = vmul.f32 %v947_v19, %v2291_v44  ;;  %p1961_p3 = pnand %p1960_p0, %p1956_p8 }
 0x19b   : > { %v898_v49 = vmul.f32 %v1838_v33, %v897_v42  ;;  %v980_v61 = vadd.f32 %v978_v41, %v682_v48  ;;  %vm956_vm0 = vmor %vm954_vm15, %vm955_vm13 }
 0x19c   : > { %v951_v58 = vsub.f32 1.0, %v950_v46 }
 0x19d   : > { %v899_v62 = vadd.f32 %v1838_v33, %v898_v49  ;;  %1841 = vtanh.f32 %v980_v61 }
 0x19e   : > { %v952_v0 = vmul.f32 %v1840_v40, %v951_v58 }
 0x19f   : > { %v903_v54 = vsel %vm902_vm11, %v1838_v33, %v899_v62 }
 0x1a0   : > { %v953_v6 = vadd.f32 %v1840_v40, %v952_v0  ;;  %v908_v7 = vsel %vm905_vm12, %v907_v1, %v903_v54 }
 0x1a1   : > { %v979_v10 = vmul.f32 %v976_v4, %v908_v7 }
 0x1a2   : > { %v957_v18 = vsel %vm956_vm0, %v1840_v40, %v953_v6 }
 0x1a3   : > { %v981_v15 = vadd.f32 %v979_v10, %v684_v8  ;;  %v1842_v16 = vpop.eup %1841  ;;  %v962_v20 = vsel %vm959_vm3, %v961_v57, %v957_v18  ;;  %v687_v57 = vadd.f32 %v2283_v60, %v2314_v3 }
 0x1a4   : > { %v986_v24 = vmul.f32 %v1842_v16, %v984_v23  ;;  %v985_v25 = vsub.f32 1.0, %v962_v20  ;;  %v989_v26 = vmul.f32 %v962_v20, %v2293_v45 }
 0x1a5   : > { %1843 = vtanh.f32 %v981_v15 }
 0x1a6   : > { %v2351_v29 = vadd.f32 %v988_v28, %v986_v24 }
 0x1ab   : > { %v1844_v27 = vpop.eup %1843 }
 0x1ac   : > { %v987_v21 = vmul.f32 %v1844_v27, %v985_v25 }
 0x1ae   : > { %v2353_v30 = vadd.f32 %v989_v26, %v987_v21 }
 0x1b0   : > { %v992_v31 = vpack.c.bf16 %v2353_v30, %v2351_v29 }
 0x1b2   : > { %1673 = vmatmul.msk.bf16.vlgmr.msrb.gmra.mxu3 %vm543_vm2, %v992_v31  ;;  %1676 = vmatmul.msk.bf16.vlgmr.msra.gmra.mxu0 %vm543_vm2, %v992_v31 }
 0x1b3   : > { %1679 = vmatmul.msk.bf16.vlgmr.msra.gmra.mxu1 %vm543_vm2, %v992_v31 }
 0x22f   : > { %v1059_v44 = vpop.f32.mrf.mxu0 }
 0x230   : > { %v1064_v33 = vadd.f32 %v1059_v44, %v657_v32  ;;  %v1113_v2 = vpop.f32.mrf.mxu1 }
 0x231   : > { %v1114_v11 = vadd.f32 %v2276_v50, %v1113_v2 }
 0x232   : > { %v1677_v45 = vmul.f32 -1.442695, %v1064_v33 }
 0x234   : > { %1845 = vpow2.f32 %v1677_v45 }
 0x235   : > { %v1005_v35 = vpop.f32.mrf.mxu3 }
 0x236   : > { %v1010_v37 = vadd.f32 %v1005_v35, %v627_v34 }
 0x237   : > { %v1061_v38 = vpop.f32.mrf.mxu0 }
 0x238   : > { %v1674_v39 = vmul.f32 -1.442695, %v1010_v37  ;;  %v1065_v40 = vadd.f32 %v1061_v38, %v659_v36  ;;  %v1115_v32 = vpop.f32.mrf.mxu1 }
 0x239   : > { %v1116_v34 = vadd.f32 %v2276_v50, %v1115_v32 }
 0x23a   : > { %v1846_v41 = vpop.eup %1845  ;;  %1847 = vpow2.f32 %v1674_v39  ;;  %v1678_v42 = vmul.f32 -1.442695, %v1065_v40  ;;  %v689_v39 = vadd.f32 %v2283_v60, %v2320_v17 }
 0x23b   : > { %v2367_v52 = vadd.f32 1.0, %v1846_v41 }
 0x23c   : > { %1849 = vpow2.f32 %v1678_v42 }
 0x23d   : > { %v1007_v53 = vpop.f32.mrf.mxu3  ;;  %1851 = vrcp.f32 %v2367_v52  ;;  %v1085_v16 = vand.u32 2147483648, %v2367_v52  ;;  %vm1079_vm9 = vweird.f32 %v2367_v52  ;;  %v1083_v24 = vand.u32 2147483647, %v2367_v52 }
 0x23e   : > { %v1011_v22 = vadd.f32 %v1007_v53, %v629_v43 }
 0x23f   : > { %v1086_v44 = vor.u32 1.1754944e-38, %v1085_v16  ;;  %vm1084_vm13 = vcmp.eq.f32.partialorder %v1083_v24, 8.507059e+37 }
 0x240   : > { %v1848_v55 = vpop.eup %1847  ;;  %v1675_v46 = vmul.f32 -1.442695, %v1011_v22 }
 0x241   : > { %v1018_v48 = vadd.f32 1.0, %v1848_v55 }
 0x242   : > { %v1850_v49 = vpop.eup %1849  ;;  %1853 = vpow2.f32 %v1675_v46 }
 0x243   : > { %1855 = vrcp.f32 %v1018_v48  ;;  %v1852_v51 = vpop.eup %1851  ;;  %v2375_v58 = vadd.f32 1.0, %v1850_v49  ;;  %v1031_v54 = vand.u32 2147483648, %v1018_v48  ;;  %v1029_v5 = vand.u32 2147483647, %v1018_v48 }
 0x244   : > { %v1075_v12 = vmul.f32 %v1852_v51, %v2367_v52  ;;  %vm1025_vm5 = vweird.f32 %v1018_v48  ;;  %vm1080_vm8 = vweird.f32 %v1852_v51 }
 0x245   : > { %1857 = vrcp.f32 %v2375_v58  ;;  %v1032_v10 = vor.u32 1.1754944e-38, %v1031_v54  ;;  %vm1030_vm7 = vcmp.eq.f32.partialorder %v1029_v5, 8.507059e+37  ;;  %vm2389_vm10 = vmor %vm1079_vm9, %vm1080_vm8  ;;  %v1100_v40 = vand.u32 2147483648, %v2375_v58 }
 0x246   : > { %v1076_v63 = vsub.f32 1.0, %v1075_v12  ;;  %vm1094_vm1 = vweird.f32 %v2375_v58  ;;  %v1098_v42 = vand.u32 2147483647, %v2375_v58 }
 0x247   : > { %v1101_v46 = vor.u32 1.1754944e-38, %v1100_v40 }
 0x248   : > { %v1854_v56 = vpop.eup %1853  ;;  %v1077_v6 = vmul.f32 %v1852_v51, %v1076_v63 }
 0x249   : > { %v1856_v59 = vpop.eup %1855  ;;  %v1019_v61 = vadd.f32 1.0, %v1854_v56 }
 0x24a   : > { %v1021_v62 = vmul.f32 %v1856_v59, %v1018_v48  ;;  %vm1026_vm4 = vweird.f32 %v1856_v59  ;;  %v1078_v15 = vadd.f32 %v1852_v51, %v1077_v6 }
 0x24b   : > { %1859 = vrcp.f32 %v1019_v61  ;;  %v2379_v0 = vpop.eup %1857  ;;  %vm1027_vm6 = vmor %vm1025_vm5, %vm1026_vm4  ;;  %v1046_v25 = vand.u32 2147483648, %v1019_v61  ;;  %v1044_v26 = vand.u32 2147483647, %v1019_v61  ;;  %vm1040_vm12 = vweird.f32 %v1019_v61 }
 0x24c   : > { %v1022_v1 = vsub.f32 1.0, %v1021_v62  ;;  %v1090_v7 = vmul.f32 %v2379_v0, %v2375_v58  ;;  %v1082_v3 = vsel %vm2389_vm10, %v1852_v51, %v1078_v15  ;;  %vm1095_vm0 = vweird.f32 %v2379_v0 }
 0x24d   : > { %v1047_v45 = vor.u32 1.1754944e-38, %v1046_v25  ;;  %vm1045_vm15 = vcmp.eq.f32.partialorder %v1044_v26, 8.507059e+37  ;;  %v1087_v36 = vsel %vm1084_vm13, %v1086_v44, %v1082_v3  ;;  %vm1096_vm3 = vmor %vm1094_vm1, %vm1095_vm0  ;;  %vm1099_vm4 = vcmp.eq.f32.partialorder %v1098_v42, 8.507059e+37 }
 0x24e   : > { %v1023_v4 = vmul.f32 %v1856_v59, %v1022_v1  ;;  %v1091_v19 = vsub.f32 1.0, %v1090_v7  ;;  %v1124_v52 = vsub.f32 1.0, %v1087_v36  ;;  %v1128_v55 = vmul.f32 %v1087_v36, %v2351_v29 }
 0x24f   : > { %vm547_vm5 = vcmask 8192   ;;  %v2061_v29 = vmov -1e+30  }
 0x250   : > { %v1024_v8 = vadd.f32 %v1856_v59, %v1023_v4  ;;  %v1092_v31 = vmul.f32 %v2379_v0, %v1091_v19  ;;  %548 = vst.msk [vmem:[#allocation3] sm:$0x1] %vm547_vm5, %v2061_v29 }
 0x251   : > { %v1860_v9 = vpop.eup %1859 }
 0x252   : > { %v1028_v13 = vsel %vm1027_vm6, %v1856_v59, %v1024_v8  ;;  %v1036_v14 = vmul.f32 %v1860_v9, %v1019_v61  ;;  %vm1041_vm11 = vweird.f32 %v1860_v9  ;;  %v1093_v37 = vadd.f32 %v2379_v0, %v1092_v31  ;;  %v1201_v59 = vld [vmem:[%s2515_s6] sm:$0x3] }
 0x253   : > { %v1033_v18 = vsel %vm1030_vm7, %v1032_v10, %v1028_v13  ;;  %vm1042_vm14 = vmor %vm1040_vm12, %vm1041_vm11  ;;  %vm1205_vm6 = vcmask 1041408   ;;  %vm545_vm7 = vcmask 15360  }
 0x254   : > { %v1118_v20 = vmul.f32 %v1114_v11, %v1033_v18  ;;  %v1037_v23 = vsub.f32 1.0, %v1036_v14  ;;  %v1097_v53 = vsel %vm1096_vm3, %v2379_v0, %v1093_v37  ;;  %1685 = vmatpush.msk.msra.mxu3 %vm1205_vm6, %v1201_v59 }
 0x255   : > { %v1102_v17 = vsel %vm1099_vm4, %v1101_v46, %v1097_v53 }
 0x256   : > { %v1120_v21 = vadd.f32 %v1118_v20, %v687_v57  ;;  %v1038_v28 = vmul.f32 %v1860_v9, %v1037_v23  ;;  %v1125_v47 = vsub.f32 1.0, %v1102_v17  ;;  %v1129_v51 = vmul.f32 %v1102_v17, %v2353_v30  ;;  %1687 = vmatpush.msk.msrb.mxu3 %vm1205_vm6, %v1201_v59 }
 0x257   : > { %v2062_v30 = vmov 0.0   ;;  %v1175_v10 = vld [vmem:[#allocation3] sm:$0x1] }
 0x258   : > { %1861 = vtanh.f32 %v1120_v21  ;;  %v1039_v33 = vadd.f32 %v1860_v9, %v1038_v28  ;;  %546 = vst.msk [vmem:[#allocation2] sm:$0xff] %vm545_vm7, %v2062_v30  ;;  %v1258_v21 = vld [vmem:[%s537_s20] sm:$0xf] }
 0x259   : > { %544 = vst.msk [vmem:[%s2432_s21] sm:$0xff] %vm543_vm2, %v2062_v30 }
 0x25a   : > { %v1043_v35 = vsel %vm1042_vm14, %v1860_v9, %v1039_v33 }
 0x25b   : > { %v1048_v38 = vsel %vm1045_vm15, %v1047_v45, %v1043_v35 }
 0x25c   : > { %v1119_v41 = vmul.f32 %v1116_v34, %v1048_v38 }
 0x25e   : > { %v1862_v50 = vpop.eup %1861  ;;  %v1121_v43 = vadd.f32 %v1119_v41, %v689_v39  ;;  %v1712_v39 = vld [vmem:[#allocation7] sm:$0xff] }
 0x25f   : > { %v1126_v22 = vmul.f32 %v1862_v50, %v1124_v52  ;;  %v1282_v26 = vld [vmem:[#allocation2] sm:$0xff]  ;;  %1366 = vmatpush.bf16.msrb.mxu2 %v1712_v39 }
 0x260   : > { %1863 = vtanh.f32 %v1121_v43  ;;  %v1262_v42 = vld [vmem:[%s2432_s21] sm:$0xff] }
 0x261   : > { %v2406_v60 = vadd.f32 %v1128_v55, %v1126_v22 }
 0x266   : > { %v1864_v48 = vpop.eup %1863 }
 0x267   : > { %v1127_v49 = vmul.f32 %v1864_v48, %v1125_v47 }
 0x269   : > { %v2409_v58 = vadd.f32 %v1129_v51, %v1127_v49 }
 0x26b   : > { %v1132_v12 = vpack.c.bf16 %v2409_v58, %v2406_v60 }
 0x26d   : > { %1684 = vmatmul.msk.bf16.vlgmr.msra.gmra.mxu2 %vm543_vm2, %v1132_v12 }
 0x2f0   : > { %v1153_v56 = vpop.f32.mrf.mxu2 }
 0x2f1   : > { %v1160_v61 = vmul.f32 0.01, %v1153_v56  ;;  %vm1158_vm8 = vcmp.gt.f32.partialorder %v1153_v56, 0.0 }
 0x2f3   : > { %v1162_v63 = vsel %vm1158_vm8, %v1153_v56, %v1160_v61 }
 0x2f4   : > { %v1177_v2 = vsel %vm545_vm7, %v1162_v63, -inf }
 0x2f8   : > { %v1155_v62 = vpop.f32.mrf.mxu2 }
 0x2f9   : > { %vm1159_vm9 = vcmp.gt.f32.partialorder %v1155_v62, 0.0  ;;  %v1161_v0 = vmul.f32 0.01, %v1155_v62 }
 0x2fb   : > { %v1163_v1 = vsel %vm1159_vm9, %v1155_v62, %v1161_v0 }
 0x2fc   : > { %v1178_v54 = vsel %vm545_vm7, %v1163_v1, -inf }
 0x2fd   : > { %v1179_v4 = vmax.f32 %v1177_v2, %v1178_v54 }
 0x2ff   : > { %v1180_v5 = vrot.slane %v1179_v4, 4 }
 0x301   : > { %v1181_v6 = vmax.f32 %v1179_v4, %v1180_v5 }
 0x303   : > { %v1182_v7 = vrot.slane %v1181_v6, 2 }
 0x305   : > { %v1183_v8 = vmax.f32 %v1181_v6, %v1182_v7 }
 0x307   : > { %v1184_v9 = vrot.slane %v1183_v8, 1 }
 0x309   : > { %v1185_v11 = vmax.f32 %v1183_v8, %v1184_v9 }
 0x30b   : > { %v1186_v13 = vmax.f32 %v1175_v10, %v1185_v11 }
 0x30d   : > { %v1187_v14 = vsub.f32 %v1175_v10, %v1186_v13  ;;  %v1191_v15 = vperm.slane %v1186_v13, 0  ;;  %1304 = vst.msk [vmem:[#allocation3] sm:$0x1] %vm547_vm5, %v1186_v13 }
 0x30f   : > { %v1188_v18 = vmul.f32 1.442695, %v1187_v14  ;;  %v1193_v19 = vsub.f32 %v1162_v63, %v1191_v15  ;;  %v1194_v57 = vsub.f32 %v1163_v1, %v1191_v15 }
 0x311   : > { %1865 = vpow2.f32 %v1188_v18  ;;  %v1195_v16 = vmul.f32 1.442695, %v1193_v19  ;;  %v1197_v20 = vmul.f32 1.442695, %v1194_v57 }
 0x313   : > { %1867 = vpow2.f32 %v1195_v16 }
 0x314   : > { %1869 = vpow2.f32 %v1197_v20 }
 0x317   : > { %v1866_v23 = vpop.eup %1865 }
 0x318   : > { %1686 = vmatmul.msk.f32.vlgmr.msra.gmra.mxu3 %vm545_vm7, %v1866_v23  ;;  %v1283_v28 = vperm.slane %v1866_v23, 0 }
 0x319   : > { %v1868_v24 = vpop.eup %1867  ;;  %1692 = vmatpush.msk.msra.mxu3 %vm1205_vm6, %v1201_v59 }
 0x31a   : > { %v1870_v25 = vpop.eup %1869  ;;  %v1285_v31 = vmul.f32 %v1283_v28, %v1282_v26 }
 0x31b   : > { %v1286_v27 = vpack.c.bf16 %v1870_v25, %v1868_v24 }
 0x31d   : > { %1294 = vmatpush.bf16.msrb.mxu1 %v1286_v27 }
 0x320   : > { %1691 = vmatmul.msk.bf16.vlgmr.msrb.gmra.mxu1 %vm543_vm2, %v1258_v21  ;;  %1688 = vmatmul.msk.f32.vlgmr.msrb.gmra.mxu3 %vm545_vm7, %v1868_v24 }
 0x328   : > { %1689 = vmatmul.msk.f32.gmra.mxu3 %vm545_vm7, %v1870_v25 }
 0x39b   : > { %v1226_v3 = vpop.f32.mrf.mxu3 }
 0x39c   : > { %v1263_v41 = vperm.slane %v1226_v3, 0 }
 0x39d   : > { %v1296_v32 = vpop.f32.mrf.mxu1 }
 0x39e   : > { %v1300_v44 = vadd.f32 %v1296_v32, %v1285_v31  ;;  %v1264_v52 = vmul.f32 %v1263_v41, %v1262_v42 }
 0x3a0   : > { %1302 = vst.msk [vmem:[#allocation2] sm:$0xff] %vm545_vm7, %v1300_v44  ;;  %1693 = vmatmul.msk.f32.vlgmr.msra.gmra.mxu3 %vm545_vm7, %v1300_v44 }
 0x3a3   : > { %v1252_v33 = vpop.f32.mrf.mxu3 }
 0x3a4   : > { %v1259_v35 = vmul.f32 %v1252_v33, %v2406_v60 }
 0x3a5   : > { %v1298_v45 = vpop.f32.mrf.mxu1 }
 0x3ab   : > { %v1255_v34 = vpop.f32.mrf.mxu3 }
 0x3ac   : > { %v1260_v36 = vmul.f32 %v1255_v34, %v2409_v58 }
 0x3ae   : > { %v1261_v37 = vpack.c.bf16 %v1260_v36, %v1259_v35 }
 0x3b0   : > { %1275 = vmatpush.bf16.msrb.mxu0 %v1261_v37 }
 0x3b3   : > { %1690 = vmatmul.msk.bf16.vlgmr.msrb.gmra.mxu0 %vm543_vm2, %v1258_v21 }
 0x423   : > { %v1328_v38 = vpop.f32.mrf.mxu3 }
 0x424   : > { %vm1331_vm10 = vcmp.gt.f32.partialorder %v1328_v38, 0.0 }
 0x425   : > { %v1332_v40 = vsel %vm1331_vm10, %v1328_v38, 1.0 }
 0x426   : > { %1871 = vrcp.f32 %v1332_v40 }
 0x42c   : > { %v1872_v53 = vpop.eup %1871 }
 0x430   : > { %v1277_v50 = vpop.f32.mrf.mxu0 }
 0x431   : > { %v1281_v43 = vadd.f32 %v1277_v50, %v1264_v52 }
 0x433   : > { %v1334_v22 = vmul.f32 %v1872_v53, %v1281_v43  ;;  %1301 = vst.msk [vmem:[%s2432_s21] sm:$0xff] %vm543_vm2, %v1281_v43 }
 0x435   : > { %v1335_v55 = vsel %vm1331_vm10, %v1334_v22, 0.0 }
 0x436   : > { %v1337_v46 = vmin.f32 %v1335_v55, 0.0  ;;  %vm1336_vm11 = vcmp.gt.f32.partialorder %v1335_v55, 0.0 }
 0x438   : > { %v1338_v60 = vmul.f32 1.442695, %v1337_v46  ;;  %v1279_v17 = vpop.f32.mrf.mxu0 }
 0x43a   : > { %1873 = vpow2.f32 %v1338_v60 }
 0x440   : > { %v1874_v47 = vpop.eup %1873 }
 0x441   : > { %v1694_v48 = vadd.f32 -1.0, %v1874_v47 }
 0x443   : > { %v1341_v49 = vsel %vm1336_vm11, %v1335_v55, %v1694_v48 }
 0x444   : > { %v1343_v51 = vpack.c.bf16 %v1341_v49, %v1341_v49  ;;  %1342 = vst.msk [vmem:[%s2432_s21] sm:$0xff] %vm543_vm2, %v1341_v49 }
 0x446   : > { %1699 = vmatmul.msk.bf16.vlgmr.msrb.gmra.mxu2 %vm543_vm2, %v1343_v51 }
 0x447   : > { %1964 = shalt.err (!%p1961_p3)
}
 0x448   : > { %1723 = dma.vmem_to_hbm [thread:$0]  (%p2196_p5), %s1402_s22, 128, %s1404_s11, %s1385_s13   ;;  %v1164_v12 = vlaneseq  ;;  %vm1382_vm13 = vcmask 122880  }
 0x449   : > { %s2548_s10 = sld [smem:[#allocation20_spill]]  ;;  %s507_s13 = scalar_lea.vmem [#allocation10], %s2217_s7 }
 0x44a   : > { %v1165_v59 = vshrl.u32 %v1164_v12, 7  ;;  %s2549_s22 = sld [smem:[#allocation22_spill]]  ;;  %s1414_s24 = sshll.u32 %s507_s13, 4  ;;  %s1415_s24 = int_to_ptr.vmem [resolvable:$true] %s1414_s24 }
 0x44b   : > { %s1390_s28 = scalar_lea.sflag [#allocation11], %s2217_s7 }
 0x44c   : > { %vm1373_vm12 = vcmp.lt.s32.totalorder %v1165_v59, 6 }
 0x44f   : > { %v1804_v58 = vld [vmem:[%s2548_s10] ss:$0 sm:$0xff] }
 0x450   : > { %s1412_s11 = scalar_lea.hbm %s2549_s22, %s2047_s16  ;;  %s1985_s20 = scalar_lea.hbm %s2549_s22, 2 }
 0x451   : > { %s1416_s9 = sshll.u32 %s1412_s11, 4  ;;  %s1417_s9 = int_to_ptr.hbm [resolvable:$true] %s1416_s9 }
 0x452   : > { %s1979_s23 = sshra.s32 %s1417_s9, 4  ;;  %s1980_s23 = int_to_ptr.hbm [resolvable:$true] %s1979_s23 }
 0x453   : > { %s1981_s12 = scalar_lea.hbm %s1980_s23, 1  ;;  %p1986_p2 = scmp.lt.s32.totalorder %s1980_s23, %s2549_s22 }
 0x454   : > { %p1982_p7 = scmp.ne.s32.totalorder %s1980_s23, %s1981_s12  ;;  %p1987_p1 = scmp.lt.s32.totalorder %s1985_s20, %s1981_s12 }
 0x456   : > { %p1983_p9 = pnand %p1982_p7, %p2196_p5  ;;  %p1988_p4 = por %p1987_p1, %p1986_p2 }
 0x458   : > { %p1984_p10 = pneg %p1983_p9 }
 0x45a   : > { %p1989_p8 = pnand %p1988_p4, %p1984_p10 }
 0x4c9   : > { %v1368_v29 = vpop.f32.mrf.mxu2 }
 0x4ca   : > { %v1369_v56 = vadd.f32 %v1804_v58, %v1368_v29 }
 0x4cc   : > { %1875 = vtanh.f32 %v1369_v56 }
 0x4d1   : > { %v1370_v61 = vpop.f32.mrf.mxu2 }
 0x4d2   : > { %v1876_v30 = vpop.eup %1875 }
 0x4d3   : > { %v1374_v62 = vsel %vm1373_vm12, %v1876_v30, 0.0 }
 0x4d4   : > { %v1375_v63 = vsel %vm543_vm2, %v1374_v62, 0.0 }
 0x4d5   : > { %v1376_v0 = vrot.slane %v1375_v63, 4 }
 0x4d7   : > { %v1377_v1 = vadd.f32 %v1376_v0, %v1375_v63 }
 0x4d9   : > { %v1378_v2 = vrot.slane %v1377_v1, 2 }
 0x4db   : > { %v1379_v54 = vadd.f32 %v1378_v2, %v1377_v1 }
 0x4dd   : > { %v1380_v4 = vrot.slane %v1379_v54, 1 }
 0x4df   : > { %v1381_v5 = vadd.f32 %v1380_v4, %v1379_v54 }
 0x4e1   : > { %1383 = vst.msk [vmem:[%s507_s13] sm:$0x1] %vm1382_vm13, %v1381_v5 }
 0x4e2   : > { %1992 = shalt.err (!%p1989_p8)
}
 0x4e3   : > { %1724 = dma.vmem_to_hbm [thread:$0]  (%p2196_p5), %s1415_s24, 16, %s1417_s9, %s1390_s28  }
 0x4e4 PF: > { %s2550_s7 = sld [smem:[#allocation16_spill]]  ;;  %p1736_p12 = pnand %p1609_p11, %p2167_p6 }
 0x4e6   : > { %p1737_p13 = pneg %p1736_p12 }
 0x4ea   : > { %s1428_s26 = sand.u32 1, %s2550_s7  }
 0x4eb   : > { %s1429_s30 = scalar_lea.sflag [#allocation6], %s1428_s26 }
 0x4ec   : > { %2026 = dma.done.wait (%p1737_p13), %s1429_s30, 128  }
 0x4ed   : > { %2028 = vsyncadd (%p1737_p13), %s1429_s30, 4294967168  ;;  %s1439_s11 = scalar_lea.sflag [#allocation11], %s1428_s26 }
 0x4ee   : > { %2030 = dma.done.wait (%p1737_p13), %s1439_s11, 16  }
 0x4ef   : > { %2032 = vsyncadd (%p1737_p13), %s1439_s11, 4294967280  ;;  %s31_s18 = sadd.s32 1, %s2055_s18   ;;  %s2552_s25 = sld [smem:[#allocation18_spill]] }
 0x4f0   : > { %p28_p0 = scmp.ge.s32.totalorder %s31_s18, 4   ;;  %s2553_s13 = smov %s2039_s14 }
 0x4f1   : > { %s2554_s14 = smov %s2043_s15  ;;  %s2555_s15 = smov %s2205_s27 }
 0x4f2   : > { %s2556_s16 = smov %s2051_s17  ;;  %30 = sbr.rel (!%p28_p0) target bundleno = 14 (0xe), region = 152 }
 0x4f5   : > { %s2557_s17 = smov %s2552_s25 }
 0x4f7   :  { %1444 = vsyncpa [#allocation5], 1 }
 0x4f8   :  { %1446 = vsyncpa [#allocation5 + $0x1], 1 }
 0x4f9   :  { %1447 = vsyncpa [#allocation8], 1 }
 0x4fa   :  { %1448 = vsyncpa [#allocation6], 1 }
 0x4fb   :  { %1450 = vsyncpa [#allocation6 + $0x1], 1 }
 0x4fc   :  { %1451 = vsyncpa [#allocation11], 1 }
 0x4fd   :  { %1453 = vsyncpa [#allocation11 + $0x1], 1 }

</bundles_post_ra>
